<compile_context>
chip_gen: v5e
topology: v5e:2x2
jax: 0.10.0
libtpu: 0.0.40
codegen_flags: <defaults>
</compile_context>

<pallas_src>
import functools
import math

import jax
import jax.numpy as jnp
from jax.experimental import pallas as pl
from jax.experimental.pallas import tpu as pltpu


def _round_up(x, m):
    return ((x + m - 1) // m) * m


# --------------------------------------------------------------------------
# Packed-small-parameter layout (shared by init_params and the kernel).
# Per layer: 8 lane-aligned slots [bqkv, bo, ln1w, ln1b, b1, b2, ln2w, ln2b],
# then the (padded) classifier bias after the last layer block.
# --------------------------------------------------------------------------
_NUM_SLOTS = 8


def _pack_layout(E, F):
    slot = _round_up(max(3 * E, F, E), 128)      # lane-aligned slot width
    stride = _NUM_SLOTS * slot                   # lanes per layer
    return slot, stride


# ----------------------------------------------------------------------------
# Fused forward kernel (single pallas_call for the whole model)
# ----------------------------------------------------------------------------
def fused_forward_kernel(tok_ref, embed_ref, pos_ref,
                         wqkv_ref, wo_ref, w1_ref, w2_ref, fcw_ref,
                         small_ref, o_ref,
                         *, batch, seq_len, num_heads, num_layers):
    f32 = jnp.float32
    bf16 = jnp.bfloat16
    B, S, H, L = batch, seq_len, num_heads, num_layers
    BS = B * S
    V, E = embed_ref.shape
    F = w1_ref.shape[2]
    hd = E // H
    slot, stride = _pack_layout(E, F)
    Bp, Vp = o_ref.shape

    def sv(layer, slot_idx, width):
        """Static (1, width) lane-aligned slice of the packed small params."""
        off = layer * stride + slot_idx * slot
        return small_ref[:, off:off + width]                     # (1, width) f32

    def layer_norm(y, w, b):
        # fused stats: var = E[y^2] - mu^2 (one pass over y)
        mu = jnp.mean(y, axis=-1, keepdims=True)
        ms = jnp.mean(y * y, axis=-1, keepdims=True)
        var = ms - mu * mu
        return (y - mu) * jax.lax.rsqrt(var + 1e-5) * w + b

    def mha(x_in, l, last_only):
        """Self-attention + out-projection.

        Returns (B, E) if last_only (final token per sequence) else (BS, E).
        The 1/sqrt(hd) scale is already folded into the Q weights/bias.
        """
        b_qkv = sv(l, 0, 3 * E)
        b_o = sv(l, 1, E)
        qkv = jnp.dot(x_in.astype(bf16), wqkv_ref[l],
                      preferred_element_type=f32) + b_qkv         # (BS, 3E) f32
        wo_l = wo_ref[l]                                          # (H, hd, E) bf16
        rows = B if last_only else BS

        attn = None
        for h in range(H):                                        # static unroll (H tiny)
            q_h = qkv[:, h * hd:(h + 1) * hd].reshape(B, S, hd)
            k_h = qkv[:, E + h * hd:E + (h + 1) * hd].reshape(B, S, hd)
            v_h = qkv[:, 2 * E + h * hd:2 * E + (h + 1) * hd].reshape(B, S, hd)
            if last_only:
                q_h = q_h[:, S - 1:S, :]                          # (B, 1, hd)

            s = jnp.einsum('bqd,bkd->bqk', q_h.astype(bf16), k_h.astype(bf16),
                           preferred_element_type=f32)            # (B, Sq, S)
            s = s - jnp.max(s, axis=-1, keepdims=True)
            p = jnp.exp(s)
            p = p * pl.reciprocal(jnp.sum(p, axis=-1, keepdims=True), approx=True)
            ctx = jnp.einsum('bqk,bkd->bqd', p.astype(bf16), v_h.astype(bf16),
                             preferred_element_type=f32)          # (B, Sq, hd)

            # fold the out-projection per head:
            #   concat_h(ctx_h) @ Wo == sum_h ctx_h @ Wo[h*hd:(h+1)*hd, :]
            term = jnp.dot(ctx.reshape(rows, hd).astype(bf16), wo_l[h],
                           preferred_element_type=f32)            # (rows, E)
            attn = term if attn is None else attn + term
        return attn + b_o

    def ffn_ln2(x1, l):
        b1 = sv(l, 4, F)
        b2 = sv(l, 5, E)
        h1 = jnp.maximum(
            jnp.dot(x1.astype(bf16), w1_ref[l], preferred_element_type=f32) + b1,
            0.0)
        h2 = jnp.dot(h1.astype(bf16), w2_ref[l],
                     preferred_element_type=f32) + b2
        return layer_norm(x1 + h2, sv(l, 6, E), sv(l, 7, E))

    # ---- embedding (one-hot matmul, bf16 operands) + positional encoding ----
    tok = tok_ref[...]                                            # (BS, 1) int32
    vocab_iota = jax.lax.broadcasted_iota(jnp.int32, (BS, V), 1)
    one_hot = (tok == vocab_iota).astype(bf16)                    # (BS, V)
    x = jnp.dot(one_hot, embed_ref[...], preferred_element_type=f32)  # (BS, E)
    x = (x.reshape(B, S, E) + pos_ref[...]).reshape(BS, E)        # broadcast add

    # ---- full encoder layers (all tokens feed the next layer's K/V) ---------
    for l in range(L - 1):                                        # static unroll (L tiny)
        attn = mha(x, l, last_only=False)                         # (BS, E)
        x1 = layer_norm(x + attn, sv(l, 2, E), sv(l, 3, E))
        x = ffn_ln2(x1, l)

    # ---- last layer: only the final token of each sequence is needed --------
    l = L - 1
    attn_last = mha(x, l, last_only=True)                         # (B, E)
    x_last = x.reshape(B, S, E)[:, S - 1, :]                      # (B, E)
    x1 = layer_norm(x_last + attn_last, sv(l, 2, E), sv(l, 3, E))
    x_out = ffn_ln2(x1, l)                                        # (B, E)

    # ---- classifier: pad rows to a full 8-sublane tile (unmasked store) ------
    if Bp > B:
        x_out = jnp.concatenate([x_out, jnp.zeros((Bp - B, E), f32)], axis=0)
    fc_b = sv(L, 0, Vp)                                           # stored after layer blocks
    logits = jnp.dot(x_out.astype(bf16), fcw_ref[...],
                     preferred_element_type=f32) + fc_b
    o_ref[...] = logits.astype(o_ref.dtype)


# ----------------------------------------------------------------------------
# Wrapper
# ----------------------------------------------------------------------------
def transformer_char_model_forward(tokens, params, num_heads):
    B, S = tokens.shape
    embed = params["embed"]                                       # (V, E) bf16
    V, E = embed.shape
    Vp = params["fc_w_pad"].shape[1]
    L = int(params["wqkv"].shape[0])
    Bp = _round_up(B, 8)

    pos = params["pos"][:S]                                       # (S, E) f32
    tok2d = tokens.reshape(B * S, 1).astype(jnp.int32)

    inputs = (tok2d, embed, pos,
              params["wqkv"], params["wo"], params["w1"], params["w2"],
              params["fc_w_pad"], params["small"])

    def full_spec(a):
        return pl.BlockSpec(a.shape, lambda i, _nd=a.ndim: (0,) * _nd)

    logits_pad = pl.pallas_call(
        functools.partial(fused_forward_kernel,
                          batch=B, seq_len=S, num_heads=num_heads,
                          num_layers=L),
        out_shape=jax.ShapeDtypeStruct((Bp, Vp), jnp.float32),
        grid=(1,),
        in_specs=[full_spec(a) for a in inputs],
        out_specs=pl.BlockSpec((Bp, Vp), lambda i: (0, 0)),
        compiler_params=pltpu.CompilerParams(
            dimension_semantics=("arbitrary",),
            vmem_limit_bytes=32 * 1024 * 1024),
    )(*inputs)
    return logits_pad[:B, :V]


# ----------------------------------------------------------------------------
# Parameter construction (deterministic, synthetic)
# ----------------------------------------------------------------------------
def make_positional_encoding(seq_len, embed_size):
    position = jnp.arange(seq_len, dtype=jnp.float32)[:, None]
    div_term = jnp.exp(jnp.arange(0, embed_size, 2, dtype=jnp.float32)
                       * (-math.log(10000.0) / embed_size))
    pe = jnp.zeros((seq_len, embed_size), jnp.float32)
    pe = pe.at[:, 0::2].set(jnp.sin(position * div_term))
    pe = pe.at[:, 1::2].set(jnp.cos(position * div_term))
    return pe                                                     # (S, E)


def init_params(key, vocab_size, embed_size, num_heads, num_layers, ffn_hidden,
                seq_len):
    E, F, V, L, H = embed_size, ffn_hidden, vocab_size, num_layers, num_heads
    hd = E // H
    Vp = _round_up(V, 128)
    slot, stride = _pack_layout(E, F)
    std = 0.02
    keys = jax.random.split(key, 2 + 4 * L)
    ki = iter(keys)

    def nrm(shape):
        return (std * jax.random.normal(next(ki), shape)).astype(jnp.float32)

    scale = 1.0 / math.sqrt(hd)

    # Per-layer matrices, pre-transposed to (in, out); the attention scale is
    # folded into the Q columns of the QKV projection (and its bias, zero here).
    wqkv = jnp.stack([nrm((E, 3 * E)).at[:, :E].multiply(scale)
                      for _ in range(L)])                         # (L, E, 3E)
    wo = jnp.stack([nrm((E, E)) for _ in range(L)])               # (L, E, E)
    wo = wo.reshape(L, H, hd, E)                                  # head-major rows
    w1 = jnp.stack([nrm((E, F)) for _ in range(L)])               # (L, E, F)
    w2 = jnp.stack([nrm((F, E)) for _ in range(L)])               # (L, F, E)
    fc_w = nrm((E, V))
    fc_w_pad = jnp.zeros((E, Vp), jnp.float32).at[:, :V].set(fc_w)

    # Packed small parameters (all f32), lane-aligned slots per layer.
    width = L * stride + Vp
    small = jnp.zeros((1, width), jnp.float32)

    def put(arr, layer, slot_idx, vec):
        off = layer * stride + slot_idx * slot
        return arr.at[0, off:off + vec.shape[0]].set(vec.astype(jnp.float32))

    for l in range(L):
        bqkv = jnp.zeros((3 * E,), jnp.float32)
        bqkv = bqkv.at[:E].multiply(scale)        # fold scale into Q bias (zero here)
        small = put(small, l, 0, bqkv)            # qkv bias
        small = put(small, l, 1, jnp.zeros((E,)))   # out-proj bias
        small = put(small, l, 2, jnp.ones((E,)))    # ln1 weight
        small = put(small, l, 3, jnp.zeros((E,)))   # ln1 bias
        small = put(small, l, 4, jnp.zeros((F,)))   # ffn bias 1
        small = put(small, l, 5, jnp.zeros((E,)))   # ffn bias 2
        small = put(small, l, 6, jnp.ones((E,)))    # ln2 weight
        small = put(small, l, 7, jnp.zeros((E,)))   # ln2 bias
    # classifier bias (padded to Vp) after the per-layer blocks (zero here)
    small = small.at[0, L * stride:L * stride + Vp].set(jnp.zeros((Vp,)))

    return {
        "embed": nrm((V, E)).astype(jnp.bfloat16),
        "pos": make_positional_encoding(seq_len, E),              # f32
        "wqkv": wqkv.astype(jnp.bfloat16),
        "wo": wo.astype(jnp.bfloat16),
        "w1": w1.astype(jnp.bfloat16),
        "w2": w2.astype(jnp.bfloat16),
        "fc_w_pad": fc_w_pad.astype(jnp.bfloat16),
        "small": small,                                           # f32
    }


# ----------------------------------------------------------------------------
if __name__ == "__main__":
    VOCAB_SIZE = 16
    EMBED_SIZE = 32
    NUM_HEADS = 4
    NUM_LAYERS = 2
    FFN_HIDDEN = 64
    SEQ_LEN = 8
    BATCH = 2

    key = jax.random.PRNGKey(0)
    k_tok, k_par = jax.random.split(key)

    tokens = jax.random.randint(k_tok, (BATCH, SEQ_LEN), 0, VOCAB_SIZE,
                                dtype=jnp.int32)
    params = init_params(k_par, VOCAB_SIZE, EMBED_SIZE, NUM_HEADS, NUM_LAYERS,
                         FFN_HIDDEN, SEQ_LEN)

    fwd = jax.jit(functools.partial(transformer_char_model_forward,
                                    num_heads=NUM_HEADS))
    logits = fwd(tokens, params)
    jax.block_until_ready(logits)

    assert logits.shape == (BATCH, VOCAB_SIZE), logits.shape
    assert bool(jnp.all(jnp.isfinite(logits)))
    print("KERNEL_OK")
</pallas_src>

<mosaic_0001>
module attributes {stable_mosaic.version = 11 : i64} {
  func.func @fused_forward_kernel(%arg0: i32, %arg1: memref<16x1xi32, #tpu.memory_space<vmem>>, %arg2: memref<16x32xbf16, #tpu.memory_space<vmem>>, %arg3: memref<8x32xf32, #tpu.memory_space<vmem>>, %arg4: memref<2x32x96xbf16, #tpu.memory_space<vmem>>, %arg5: memref<2x4x8x32xbf16, #tpu.memory_space<vmem>>, %arg6: memref<2x32x64xbf16, #tpu.memory_space<vmem>>, %arg7: memref<2x64x32xbf16, #tpu.memory_space<vmem>>, %arg8: memref<32x128xbf16, #tpu.memory_space<vmem>>, %arg9: memref<1x2176xf32, #tpu.memory_space<vmem>>, %arg10: memref<8x128xf32, #tpu.memory_space<vmem>>) attributes {dimension_semantics = [#tpu.dimension_semantics<arbitrary>], iteration_bounds = array<i64: 1>, scalar_prefetch = 0 : i64, scratch_operands = 0 : i64, tpu.core_type = #tpu.core_type<tc>, window_params = [{pipeline_mode = #tpu.pipeline_mode<synchronous>, transform_indices = @transform_0, window_bounds = array<i64: 16, 1>}, {pipeline_mode = #tpu.pipeline_mode<synchronous>, transform_indices = @transform_1, window_bounds = array<i64: 16, 32>}, {pipeline_mode = #tpu.pipeline_mode<synchronous>, transform_indices = @transform_2, window_bounds = array<i64: 8, 32>}, {pipeline_mode = #tpu.pipeline_mode<synchronous>, transform_indices = @transform_3, window_bounds = array<i64: 2, 32, 96>}, {pipeline_mode = #tpu.pipeline_mode<synchronous>, transform_indices = @transform_4, window_bounds = array<i64: 2, 4, 8, 32>}, {pipeline_mode = #tpu.pipeline_mode<synchronous>, transform_indices = @transform_5, window_bounds = array<i64: 2, 32, 64>}, {pipeline_mode = #tpu.pipeline_mode<synchronous>, transform_indices = @transform_6, window_bounds = array<i64: 2, 64, 32>}, {pipeline_mode = #tpu.pipeline_mode<synchronous>, transform_indices = @transform_7, window_bounds = array<i64: 32, 128>}, {pipeline_mode = #tpu.pipeline_mode<synchronous>, transform_indices = @transform_8, window_bounds = array<i64: 1, 2176>}, {pipeline_mode = #tpu.pipeline_mode<synchronous>, transform_indices = @transform_9, window_bounds = array<i64: 8, 128>}]} {
    %c0 = arith.constant 0 : index
    %c0_0 = arith.constant 0 : index
    %0 = vector.load %arg1[%c0, %c0_0] : memref<16x1xi32, #tpu.memory_space<vmem>>, vector<16x1xi32>
    %1 = tpu.iota {dimensions = array<i32: 1>} : vector<16x16xi32>
    %2 = vector.broadcast %0 : vector<16x1xi32> to vector<16x16xi32>
    %3 = arith.cmpi eq, %2, %1 : vector<16x16xi32>
    %4 = arith.extui %3 : vector<16x16xi1> to vector<16x16xi32>
    %5 = arith.sitofp %4 : vector<16x16xi32> to vector<16x16xf32>
    %6 = arith.truncf %5 : vector<16x16xf32> to vector<16x16xbf16>
    %c0_1 = arith.constant 0 : index
    %c0_2 = arith.constant 0 : index
    %7 = vector.load %arg2[%c0_1, %c0_2] : memref<16x32xbf16, #tpu.memory_space<vmem>>, vector<16x32xbf16>
    %cst = arith.constant dense<0.000000e+00> : vector<16x32xf32>
    %8 = tpu.matmul %6, %7, %cst {dimension_numbers = #tpu.dot_dimension_numbers<[1], [0], [0], [1], [0, 0, 1, 1], [], []>} : vector<16x16xbf16>, vector<16x32xbf16>, vector<16x32xf32> -> vector<16x32xf32>
    %9 = vector.shape_cast %8 : vector<16x32xf32> to vector<2x8x32xf32>
    %c0_3 = arith.constant 0 : index
    %c0_4 = arith.constant 0 : index
    %10 = vector.load %arg3[%c0_3, %c0_4] : memref<8x32xf32, #tpu.memory_space<vmem>>, vector<8x32xf32>
    %11 = vector.shape_cast %10 : vector<8x32xf32> to vector<1x8x32xf32>
    %12 = vector.broadcast %11 : vector<1x8x32xf32> to vector<2x8x32xf32>
    %13 = arith.addf %9, %12 : vector<2x8x32xf32>
    %14 = vector.shape_cast %13 : vector<2x8x32xf32> to vector<16x32xf32>
    %c0_5 = arith.constant 0 : index
    %c0_6 = arith.constant 0 : index
    %15 = vector.load %arg9[%c0_5, %c0_6] : memref<1x2176xf32, #tpu.memory_space<vmem>>, vector<1x96xf32>
    %c0_7 = arith.constant 0 : index
    %c128 = arith.constant 128 : index
    %16 = vector.load %arg9[%c0_7, %c128] : memref<1x2176xf32, #tpu.memory_space<vmem>>, vector<1x32xf32>
    %17 = arith.truncf %14 : vector<16x32xf32> to vector<16x32xbf16>
    %c0_8 = arith.constant 0 : index
    %c0_9 = arith.constant 0 : index
    %c0_10 = arith.constant 0 : index
    %18 = vector.load %arg4[%c0_8, %c0_9, %c0_10] : memref<2x32x96xbf16, #tpu.memory_space<vmem>>, vector<1x32x96xbf16>
    %19 = vector.shape_cast %18 : vector<1x32x96xbf16> to vector<32x96xbf16>
    %cst_11 = arith.constant dense<0.000000e+00> : vector<16x96xf32>
    %20 = tpu.matmul %17, %19, %cst_11 {dimension_numbers = #tpu.dot_dimension_numbers<[1], [0], [0], [1], [0, 0, 1, 1], [], []>} : vector<16x32xbf16>, vector<32x96xbf16>, vector<16x96xf32> -> vector<16x96xf32>
    %21 = vector.broadcast %15 : vector<1x96xf32> to vector<16x96xf32>
    %22 = arith.addf %20, %21 : vector<16x96xf32>
    %c0_12 = arith.constant 0 : index
    %c0_13 = arith.constant 0 : index
    %c0_14 = arith.constant 0 : index
    %c0_15 = arith.constant 0 : index
    %23 = vector.load %arg5[%c0_12, %c0_13, %c0_14, %c0_15] : memref<2x4x8x32xbf16, #tpu.memory_space<vmem>>, vector<1x4x8x32xbf16>
    %24 = vector.shape_cast %23 : vector<1x4x8x32xbf16> to vector<4x8x32xbf16>
    %25 = vector.extract_strided_slice %22 {offsets = [0, 0], sizes = [16, 8], strides = [1, 1]} : vector<16x96xf32> to vector<16x8xf32>
    %26 = vector.shape_cast %25 : vector<16x8xf32> to vector<2x8x8xf32>
    %27 = vector.extract_strided_slice %22 {offsets = [0, 32], sizes = [16, 8], strides = [1, 1]} : vector<16x96xf32> to vector<16x8xf32>
    %28 = vector.shape_cast %27 : vector<16x8xf32> to vector<2x8x8xf32>
    %29 = vector.extract_strided_slice %22 {offsets = [0, 64], sizes = [16, 8], strides = [1, 1]} : vector<16x96xf32> to vector<16x8xf32>
    %30 = vector.shape_cast %29 : vector<16x8xf32> to vector<2x8x8xf32>
    %31 = arith.truncf %26 : vector<2x8x8xf32> to vector<2x8x8xbf16>
    %32 = arith.truncf %28 : vector<2x8x8xf32> to vector<2x8x8xbf16>
    "tpu.trace_start"() <{level = 10 : i32, message = "bqd,bkd->bqk"}> : () -> ()
    %cst_16 = arith.constant dense<0.000000e+00> : vector<2x8x8xf32>
    %33 = tpu.matmul %31, %32, %cst_16 {dimension_numbers = #tpu.dot_dimension_numbers<[2], [2], [1], [1], [0, 0, 0, 1, 1, 1], [0], [0]>} : vector<2x8x8xbf16>, vector<2x8x8xbf16>, vector<2x8x8xf32> -> vector<2x8x8xf32>
    "tpu.trace_stop"() : () -> ()
    %cst_17 = arith.constant dense<0xFF800000> : vector<2x8xf32>
    %34 = vector.multi_reduction <maximumf>, %33, %cst_17 [2] : vector<2x8x8xf32> to vector<2x8xf32>
    %35 = vector.shape_cast %34 : vector<2x8xf32> to vector<2x8x1xf32>
    %36 = vector.broadcast %35 : vector<2x8x1xf32> to vector<2x8x8xf32>
    %37 = arith.subf %33, %36 : vector<2x8x8xf32>
    %38 = math.exp %37 : vector<2x8x8xf32>
    %cst_18 = arith.constant dense<0.000000e+00> : vector<2x8xf32>
    %39 = vector.multi_reduction <add>, %38, %cst_18 [2] : vector<2x8x8xf32> to vector<2x8xf32>
    %40 = vector.shape_cast %39 : vector<2x8xf32> to vector<2x8x1xf32>
    %41 = tpu.reciprocal %40 {approx = true} : vector<2x8x1xf32> -> vector<2x8x1xf32>
    %42 = vector.broadcast %41 : vector<2x8x1xf32> to vector<2x8x8xf32>
    %43 = arith.mulf %38, %42 : vector<2x8x8xf32>
    %44 = arith.truncf %43 : vector<2x8x8xf32> to vector<2x8x8xbf16>
    %45 = arith.truncf %30 : vector<2x8x8xf32> to vector<2x8x8xbf16>
    "tpu.trace_start"() <{level = 10 : i32, message = "bqk,bkd->bqd"}> : () -> ()
    %cst_19 = arith.constant dense<0.000000e+00> : vector<2x8x8xf32>
    %46 = tpu.matmul %44, %45, %cst_19 {dimension_numbers = #tpu.dot_dimension_numbers<[2], [1], [1], [2], [0, 0, 0, 1, 1, 2], [0], [0]>} : vector<2x8x8xbf16>, vector<2x8x8xbf16>, vector<2x8x8xf32> -> vector<2x8x8xf32>
    "tpu.trace_stop"() : () -> ()
    %47 = vector.shape_cast %46 : vector<2x8x8xf32> to vector<16x8xf32>
    %48 = arith.truncf %47 : vector<16x8xf32> to vector<16x8xbf16>
    %49 = vector.extract_strided_slice %24 {offsets = [0, 0, 0], sizes = [1, 8, 32], strides = [1, 1, 1]} : vector<4x8x32xbf16> to vector<1x8x32xbf16>
    %50 = vector.shape_cast %49 : vector<1x8x32xbf16> to vector<8x32xbf16>
    %cst_20 = arith.constant dense<0.000000e+00> : vector<16x32xf32>
    %51 = tpu.matmul %48, %50, %cst_20 {dimension_numbers = #tpu.dot_dimension_numbers<[1], [0], [0], [1], [0, 0, 1, 1], [], []>} : vector<16x8xbf16>, vector<8x32xbf16>, vector<16x32xf32> -> vector<16x32xf32>
    %52 = vector.extract_strided_slice %22 {offsets = [0, 8], sizes = [16, 8], strides = [1, 1]} : vector<16x96xf32> to vector<16x8xf32>
    %53 = vector.shape_cast %52 : vector<16x8xf32> to vector<2x8x8xf32>
    %54 = vector.extract_strided_slice %22 {offsets = [0, 40], sizes = [16, 8], strides = [1, 1]} : vector<16x96xf32> to vector<16x8xf32>
    %55 = vector.shape_cast %54 : vector<16x8xf32> to vector<2x8x8xf32>
    %56 = vector.extract_strided_slice %22 {offsets = [0, 72], sizes = [16, 8], strides = [1, 1]} : vector<16x96xf32> to vector<16x8xf32>
    %57 = vector.shape_cast %56 : vector<16x8xf32> to vector<2x8x8xf32>
    %58 = arith.truncf %53 : vector<2x8x8xf32> to vector<2x8x8xbf16>
    %59 = arith.truncf %55 : vector<2x8x8xf32> to vector<2x8x8xbf16>
    "tpu.trace_start"() <{level = 10 : i32, message = "bqd,bkd->bqk"}> : () -> ()
    %cst_21 = arith.constant dense<0.000000e+00> : vector<2x8x8xf32>
    %60 = tpu.matmul %58, %59, %cst_21 {dimension_numbers = #tpu.dot_dimension_numbers<[2], [2], [1], [1], [0, 0, 0, 1, 1, 1], [0], [0]>} : vector<2x8x8xbf16>, vector<2x8x8xbf16>, vector<2x8x8xf32> -> vector<2x8x8xf32>
    "tpu.trace_stop"() : () -> ()
    %cst_22 = arith.constant dense<0xFF800000> : vector<2x8xf32>
    %61 = vector.multi_reduction <maximumf>, %60, %cst_22 [2] : vector<2x8x8xf32> to vector<2x8xf32>
    %62 = vector.shape_cast %61 : vector<2x8xf32> to vector<2x8x1xf32>
    %63 = vector.broadcast %62 : vector<2x8x1xf32> to vector<2x8x8xf32>
    %64 = arith.subf %60, %63 : vector<2x8x8xf32>
    %65 = math.exp %64 : vector<2x8x8xf32>
    %cst_23 = arith.constant dense<0.000000e+00> : vector<2x8xf32>
    %66 = vector.multi_reduction <add>, %65, %cst_23 [2] : vector<2x8x8xf32> to vector<2x8xf32>
    %67 = vector.shape_cast %66 : vector<2x8xf32> to vector<2x8x1xf32>
    %68 = tpu.reciprocal %67 {approx = true} : vector<2x8x1xf32> -> vector<2x8x1xf32>
    %69 = vector.broadcast %68 : vector<2x8x1xf32> to vector<2x8x8xf32>
    %70 = arith.mulf %65, %69 : vector<2x8x8xf32>
    %71 = arith.truncf %70 : vector<2x8x8xf32> to vector<2x8x8xbf16>
    %72 = arith.truncf %57 : vector<2x8x8xf32> to vector<2x8x8xbf16>
    "tpu.trace_start"() <{level = 10 : i32, message = "bqk,bkd->bqd"}> : () -> ()
    %cst_24 = arith.constant dense<0.000000e+00> : vector<2x8x8xf32>
    %73 = tpu.matmul %71, %72, %cst_24 {dimension_numbers = #tpu.dot_dimension_numbers<[2], [1], [1], [2], [0, 0, 0, 1, 1, 2], [0], [0]>} : vector<2x8x8xbf16>, vector<2x8x8xbf16>, vector<2x8x8xf32> -> vector<2x8x8xf32>
    "tpu.trace_stop"() : () -> ()
    %74 = vector.shape_cast %73 : vector<2x8x8xf32> to vector<16x8xf32>
    %75 = arith.truncf %74 : vector<16x8xf32> to vector<16x8xbf16>
    %76 = vector.extract_strided_slice %24 {offsets = [1, 0, 0], sizes = [1, 8, 32], strides = [1, 1, 1]} : vector<4x8x32xbf16> to vector<1x8x32xbf16>
    %77 = vector.shape_cast %76 : vector<1x8x32xbf16> to vector<8x32xbf16>
    %cst_25 = arith.constant dense<0.000000e+00> : vector<16x32xf32>
    %78 = tpu.matmul %75, %77, %cst_25 {dimension_numbers = #tpu.dot_dimension_numbers<[1], [0], [0], [1], [0, 0, 1, 1], [], []>} : vector<16x8xbf16>, vector<8x32xbf16>, vector<16x32xf32> -> vector<16x32xf32>
    %79 = arith.addf %51, %78 : vector<16x32xf32>
    %80 = vector.extract_strided_slice %22 {offsets = [0, 16], sizes = [16, 8], strides = [1, 1]} : vector<16x96xf32> to vector<16x8xf32>
    %81 = vector.shape_cast %80 : vector<16x8xf32> to vector<2x8x8xf32>
    %82 = vector.extract_strided_slice %22 {offsets = [0, 48], sizes = [16, 8], strides = [1, 1]} : vector<16x96xf32> to vector<16x8xf32>
    %83 = vector.shape_cast %82 : vector<16x8xf32> to vector<2x8x8xf32>
    %84 = vector.extract_strided_slice %22 {offsets = [0, 80], sizes = [16, 8], strides = [1, 1]} : vector<16x96xf32> to vector<16x8xf32>
    %85 = vector.shape_cast %84 : vector<16x8xf32> to vector<2x8x8xf32>
    %86 = arith.truncf %81 : vector<2x8x8xf32> to vector<2x8x8xbf16>
    %87 = arith.truncf %83 : vector<2x8x8xf32> to vector<2x8x8xbf16>
    "tpu.trace_start"() <{level = 10 : i32, message = "bqd,bkd->bqk"}> : () -> ()
    %cst_26 = arith.constant dense<0.000000e+00> : vector<2x8x8xf32>
    %88 = tpu.matmul %86, %87, %cst_26 {dimension_numbers = #tpu.dot_dimension_numbers<[2], [2], [1], [1], [0, 0, 0, 1, 1, 1], [0], [0]>} : vector<2x8x8xbf16>, vector<2x8x8xbf16>, vector<2x8x8xf32> -> vector<2x8x8xf32>
    "tpu.trace_stop"() : () -> ()
    %cst_27 = arith.constant dense<0xFF800000> : vector<2x8xf32>
    %89 = vector.multi_reduction <maximumf>, %88, %cst_27 [2] : vector<2x8x8xf32> to vector<2x8xf32>
    %90 = vector.shape_cast %89 : vector<2x8xf32> to vector<2x8x1xf32>
    %91 = vector.broadcast %90 : vector<2x8x1xf32> to vector<2x8x8xf32>
    %92 = arith.subf %88, %91 : vector<2x8x8xf32>
    %93 = math.exp %92 : vector<2x8x8xf32>
    %cst_28 = arith.constant dense<0.000000e+00> : vector<2x8xf32>
    %94 = vector.multi_reduction <add>, %93, %cst_28 [2] : vector<2x8x8xf32> to vector<2x8xf32>
    %95 = vector.shape_cast %94 : vector<2x8xf32> to vector<2x8x1xf32>
    %96 = tpu.reciprocal %95 {approx = true} : vector<2x8x1xf32> -> vector<2x8x1xf32>
    %97 = vector.broadcast %96 : vector<2x8x1xf32> to vector<2x8x8xf32>
    %98 = arith.mulf %93, %97 : vector<2x8x8xf32>
    %99 = arith.truncf %98 : vector<2x8x8xf32> to vector<2x8x8xbf16>
    %100 = arith.truncf %85 : vector<2x8x8xf32> to vector<2x8x8xbf16>
    "tpu.trace_start"() <{level = 10 : i32, message = "bqk,bkd->bqd"}> : () -> ()
    %cst_29 = arith.constant dense<0.000000e+00> : vector<2x8x8xf32>
    %101 = tpu.matmul %99, %100, %cst_29 {dimension_numbers = #tpu.dot_dimension_numbers<[2], [1], [1], [2], [0, 0, 0, 1, 1, 2], [0], [0]>} : vector<2x8x8xbf16>, vector<2x8x8xbf16>, vector<2x8x8xf32> -> vector<2x8x8xf32>
    "tpu.trace_stop"() : () -> ()
    %102 = vector.shape_cast %101 : vector<2x8x8xf32> to vector<16x8xf32>
    %103 = arith.truncf %102 : vector<16x8xf32> to vector<16x8xbf16>
    %104 = vector.extract_strided_slice %24 {offsets = [2, 0, 0], sizes = [1, 8, 32], strides = [1, 1, 1]} : vector<4x8x32xbf16> to vector<1x8x32xbf16>
    %105 = vector.shape_cast %104 : vector<1x8x32xbf16> to vector<8x32xbf16>
    %cst_30 = arith.constant dense<0.000000e+00> : vector<16x32xf32>
    %106 = tpu.matmul %103, %105, %cst_30 {dimension_numbers = #tpu.dot_dimension_numbers<[1], [0], [0], [1], [0, 0, 1, 1], [], []>} : vector<16x8xbf16>, vector<8x32xbf16>, vector<16x32xf32> -> vector<16x32xf32>
    %107 = arith.addf %79, %106 : vector<16x32xf32>
    %108 = vector.extract_strided_slice %22 {offsets = [0, 24], sizes = [16, 8], strides = [1, 1]} : vector<16x96xf32> to vector<16x8xf32>
    %109 = vector.shape_cast %108 : vector<16x8xf32> to vector<2x8x8xf32>
    %110 = vector.extract_strided_slice %22 {offsets = [0, 56], sizes = [16, 8], strides = [1, 1]} : vector<16x96xf32> to vector<16x8xf32>
    %111 = vector.shape_cast %110 : vector<16x8xf32> to vector<2x8x8xf32>
    %112 = vector.extract_strided_slice %22 {offsets = [0, 88], sizes = [16, 8], strides = [1, 1]} : vector<16x96xf32> to vector<16x8xf32>
    %113 = vector.shape_cast %112 : vector<16x8xf32> to vector<2x8x8xf32>
    %114 = arith.truncf %109 : vector<2x8x8xf32> to vector<2x8x8xbf16>
    %115 = arith.truncf %111 : vector<2x8x8xf32> to vector<2x8x8xbf16>
    "tpu.trace_start"() <{level = 10 : i32, message = "bqd,bkd->bqk"}> : () -> ()
    %cst_31 = arith.constant dense<0.000000e+00> : vector<2x8x8xf32>
    %116 = tpu.matmul %114, %115, %cst_31 {dimension_numbers = #tpu.dot_dimension_numbers<[2], [2], [1], [1], [0, 0, 0, 1, 1, 1], [0], [0]>} : vector<2x8x8xbf16>, vector<2x8x8xbf16>, vector<2x8x8xf32> -> vector<2x8x8xf32>
    "tpu.trace_stop"() : () -> ()
    %cst_32 = arith.constant dense<0xFF800000> : vector<2x8xf32>
    %117 = vector.multi_reduction <maximumf>, %116, %cst_32 [2] : vector<2x8x8xf32> to vector<2x8xf32>
    %118 = vector.shape_cast %117 : vector<2x8xf32> to vector<2x8x1xf32>
    %119 = vector.broadcast %118 : vector<2x8x1xf32> to vector<2x8x8xf32>
    %120 = arith.subf %116, %119 : vector<2x8x8xf32>
    %121 = math.exp %120 : vector<2x8x8xf32>
    %cst_33 = arith.constant dense<0.000000e+00> : vector<2x8xf32>
    %122 = vector.multi_reduction <add>, %121, %cst_33 [2] : vector<2x8x8xf32> to vector<2x8xf32>
    %123 = vector.shape_cast %122 : vector<2x8xf32> to vector<2x8x1xf32>
    %124 = tpu.reciprocal %123 {approx = true} : vector<2x8x1xf32> -> vector<2x8x1xf32>
    %125 = vector.broadcast %124 : vector<2x8x1xf32> to vector<2x8x8xf32>
    %126 = arith.mulf %121, %125 : vector<2x8x8xf32>
    %127 = arith.truncf %126 : vector<2x8x8xf32> to vector<2x8x8xbf16>
    %128 = arith.truncf %113 : vector<2x8x8xf32> to vector<2x8x8xbf16>
    "tpu.trace_start"() <{level = 10 : i32, message = "bqk,bkd->bqd"}> : () -> ()
    %cst_34 = arith.constant dense<0.000000e+00> : vector<2x8x8xf32>
    %129 = tpu.matmul %127, %128, %cst_34 {dimension_numbers = #tpu.dot_dimension_numbers<[2], [1], [1], [2], [0, 0, 0, 1, 1, 2], [0], [0]>} : vector<2x8x8xbf16>, vector<2x8x8xbf16>, vector<2x8x8xf32> -> vector<2x8x8xf32>
    "tpu.trace_stop"() : () -> ()
    %130 = vector.shape_cast %129 : vector<2x8x8xf32> to vector<16x8xf32>
    %131 = arith.truncf %130 : vector<16x8xf32> to vector<16x8xbf16>
    %132 = vector.extract_strided_slice %24 {offsets = [3, 0, 0], sizes = [1, 8, 32], strides = [1, 1, 1]} : vector<4x8x32xbf16> to vector<1x8x32xbf16>
    %133 = vector.shape_cast %132 : vector<1x8x32xbf16> to vector<8x32xbf16>
    %cst_35 = arith.constant dense<0.000000e+00> : vector<16x32xf32>
    %134 = tpu.matmul %131, %133, %cst_35 {dimension_numbers = #tpu.dot_dimension_numbers<[1], [0], [0], [1], [0, 0, 1, 1], [], []>} : vector<16x8xbf16>, vector<8x32xbf16>, vector<16x32xf32> -> vector<16x32xf32>
    %135 = arith.addf %107, %134 : vector<16x32xf32>
    %136 = vector.broadcast %16 : vector<1x32xf32> to vector<16x32xf32>
    %137 = arith.addf %135, %136 : vector<16x32xf32>
    %138 = arith.addf %14, %137 : vector<16x32xf32>
    %c0_36 = arith.constant 0 : index
    %c256 = arith.constant 256 : index
    %139 = vector.load %arg9[%c0_36, %c256] : memref<1x2176xf32, #tpu.memory_space<vmem>>, vector<1x32xf32>
    %c0_37 = arith.constant 0 : index
    %c384 = arith.constant 384 : index
    %140 = vector.load %arg9[%c0_37, %c384] : memref<1x2176xf32, #tpu.memory_space<vmem>>, vector<1x32xf32>
    %cst_38 = arith.constant dense<0.000000e+00> : vector<16xf32>
    %141 = vector.multi_reduction <add>, %138, %cst_38 [1] : vector<16x32xf32> to vector<16xf32>
    %142 = vector.shape_cast %141 : vector<16xf32> to vector<16x1xf32>
    %cst_39 = arith.constant 3.200000e+01 : f32
    %143 = vector.broadcast %cst_39 : f32 to vector<16x1xf32>
    %144 = arith.divf %142, %143 : vector<16x1xf32>
    %145 = arith.mulf %138, %138 : vector<16x32xf32>
    %cst_40 = arith.constant dense<0.000000e+00> : vector<16xf32>
    %146 = vector.multi_reduction <add>, %145, %cst_40 [1] : vector<16x32xf32> to vector<16xf32>
    %147 = vector.shape_cast %146 : vector<16xf32> to vector<16x1xf32>
    %cst_41 = arith.constant 3.200000e+01 : f32
    %148 = vector.broadcast %cst_41 : f32 to vector<16x1xf32>
    %149 = arith.divf %147, %148 : vector<16x1xf32>
    %150 = arith.mulf %144, %144 : vector<16x1xf32>
    %151 = arith.subf %149, %150 : vector<16x1xf32>
    %152 = vector.broadcast %144 : vector<16x1xf32> to vector<16x32xf32>
    %153 = arith.subf %138, %152 : vector<16x32xf32>
    %cst_42 = arith.constant 9.99999974E-6 : f32
    %154 = vector.broadcast %cst_42 : f32 to vector<16x1xf32>
    %155 = arith.addf %151, %154 : vector<16x1xf32>
    %156 = math.rsqrt %155 : vector<16x1xf32>
    %157 = vector.broadcast %156 : vector<16x1xf32> to vector<16x32xf32>
    %158 = arith.mulf %153, %157 : vector<16x32xf32>
    %159 = vector.broadcast %139 : vector<1x32xf32> to vector<16x32xf32>
    %160 = arith.mulf %158, %159 : vector<16x32xf32>
    %161 = vector.broadcast %140 : vector<1x32xf32> to vector<16x32xf32>
    %162 = arith.addf %160, %161 : vector<16x32xf32>
    %c0_43 = arith.constant 0 : index
    %c512 = arith.constant 512 : index
    %163 = vector.load %arg9[%c0_43, %c512] : memref<1x2176xf32, #tpu.memory_space<vmem>>, vector<1x64xf32>
    %c0_44 = arith.constant 0 : index
    %c640 = arith.constant 640 : index
    %164 = vector.load %arg9[%c0_44, %c640] : memref<1x2176xf32, #tpu.memory_space<vmem>>, vector<1x32xf32>
    %165 = arith.truncf %162 : vector<16x32xf32> to vector<16x32xbf16>
    %c0_45 = arith.constant 0 : index
    %c0_46 = arith.constant 0 : index
    %c0_47 = arith.constant 0 : index
    %166 = vector.load %arg6[%c0_45, %c0_46, %c0_47] : memref<2x32x64xbf16, #tpu.memory_space<vmem>>, vector<1x32x64xbf16>
    %167 = vector.shape_cast %166 : vector<1x32x64xbf16> to vector<32x64xbf16>
    %cst_48 = arith.constant dense<0.000000e+00> : vector<16x64xf32>
    %168 = tpu.matmul %165, %167, %cst_48 {dimension_numbers = #tpu.dot_dimension_numbers<[1], [0], [0], [1], [0, 0, 1, 1], [], []>} : vector<16x32xbf16>, vector<32x64xbf16>, vector<16x64xf32> -> vector<16x64xf32>
    %169 = vector.broadcast %163 : vector<1x64xf32> to vector<16x64xf32>
    %170 = arith.addf %168, %169 : vector<16x64xf32>
    %cst_49 = arith.constant 0.000000e+00 : f32
    %171 = vector.broadcast %cst_49 : f32 to vector<16x64xf32>
    %172 = arith.maximumf %170, %171 : vector<16x64xf32>
    %173 = arith.truncf %172 : vector<16x64xf32> to vector<16x64xbf16>
    %c0_50 = arith.constant 0 : index
    %c0_51 = arith.constant 0 : index
    %c0_52 = arith.constant 0 : index
    %174 = vector.load %arg7[%c0_50, %c0_51, %c0_52] : memref<2x64x32xbf16, #tpu.memory_space<vmem>>, vector<1x64x32xbf16>
    %175 = vector.shape_cast %174 : vector<1x64x32xbf16> to vector<64x32xbf16>
    %cst_53 = arith.constant dense<0.000000e+00> : vector<16x32xf32>
    %176 = tpu.matmul %173, %175, %cst_53 {dimension_numbers = #tpu.dot_dimension_numbers<[1], [0], [0], [1], [0, 0, 1, 1], [], []>} : vector<16x64xbf16>, vector<64x32xbf16>, vector<16x32xf32> -> vector<16x32xf32>
    %177 = vector.broadcast %164 : vector<1x32xf32> to vector<16x32xf32>
    %178 = arith.addf %176, %177 : vector<16x32xf32>
    %179 = arith.addf %162, %178 : vector<16x32xf32>
    %c0_54 = arith.constant 0 : index
    %c768 = arith.constant 768 : index
    %180 = vector.load %arg9[%c0_54, %c768] : memref<1x2176xf32, #tpu.memory_space<vmem>>, vector<1x32xf32>
    %c0_55 = arith.constant 0 : index
    %c896 = arith.constant 896 : index
    %181 = vector.load %arg9[%c0_55, %c896] : memref<1x2176xf32, #tpu.memory_space<vmem>>, vector<1x32xf32>
    %cst_56 = arith.constant dense<0.000000e+00> : vector<16xf32>
    %182 = vector.multi_reduction <add>, %179, %cst_56 [1] : vector<16x32xf32> to vector<16xf32>
    %183 = vector.shape_cast %182 : vector<16xf32> to vector<16x1xf32>
    %cst_57 = arith.constant 3.200000e+01 : f32
    %184 = vector.broadcast %cst_57 : f32 to vector<16x1xf32>
    %185 = arith.divf %183, %184 : vector<16x1xf32>
    %186 = arith.mulf %179, %179 : vector<16x32xf32>
    %cst_58 = arith.constant dense<0.000000e+00> : vector<16xf32>
    %187 = vector.multi_reduction <add>, %186, %cst_58 [1] : vector<16x32xf32> to vector<16xf32>
    %188 = vector.shape_cast %187 : vector<16xf32> to vector<16x1xf32>
    %cst_59 = arith.constant 3.200000e+01 : f32
    %189 = vector.broadcast %cst_59 : f32 to vector<16x1xf32>
    %190 = arith.divf %188, %189 : vector<16x1xf32>
    %191 = arith.mulf %185, %185 : vector<16x1xf32>
    %192 = arith.subf %190, %191 : vector<16x1xf32>
    %193 = vector.broadcast %185 : vector<16x1xf32> to vector<16x32xf32>
    %194 = arith.subf %179, %193 : vector<16x32xf32>
    %cst_60 = arith.constant 9.99999974E-6 : f32
    %195 = vector.broadcast %cst_60 : f32 to vector<16x1xf32>
    %196 = arith.addf %192, %195 : vector<16x1xf32>
    %197 = math.rsqrt %196 : vector<16x1xf32>
    %198 = vector.broadcast %197 : vector<16x1xf32> to vector<16x32xf32>
    %199 = arith.mulf %194, %198 : vector<16x32xf32>
    %200 = vector.broadcast %180 : vector<1x32xf32> to vector<16x32xf32>
    %201 = arith.mulf %199, %200 : vector<16x32xf32>
    %202 = vector.broadcast %181 : vector<1x32xf32> to vector<16x32xf32>
    %203 = arith.addf %201, %202 : vector<16x32xf32>
    %c0_61 = arith.constant 0 : index
    %c1024 = arith.constant 1024 : index
    %204 = vector.load %arg9[%c0_61, %c1024] : memref<1x2176xf32, #tpu.memory_space<vmem>>, vector<1x96xf32>
    %c0_62 = arith.constant 0 : index
    %c1152 = arith.constant 1152 : index
    %205 = vector.load %arg9[%c0_62, %c1152] : memref<1x2176xf32, #tpu.memory_space<vmem>>, vector<1x32xf32>
    %206 = arith.truncf %203 : vector<16x32xf32> to vector<16x32xbf16>
    %c1 = arith.constant 1 : index
    %c0_63 = arith.constant 0 : index
    %c0_64 = arith.constant 0 : index
    %207 = vector.load %arg4[%c1, %c0_63, %c0_64] : memref<2x32x96xbf16, #tpu.memory_space<vmem>>, vector<1x32x96xbf16>
    %208 = vector.shape_cast %207 : vector<1x32x96xbf16> to vector<32x96xbf16>
    %cst_65 = arith.constant dense<0.000000e+00> : vector<16x96xf32>
    %209 = tpu.matmul %206, %208, %cst_65 {dimension_numbers = #tpu.dot_dimension_numbers<[1], [0], [0], [1], [0, 0, 1, 1], [], []>} : vector<16x32xbf16>, vector<32x96xbf16>, vector<16x96xf32> -> vector<16x96xf32>
    %210 = vector.broadcast %204 : vector<1x96xf32> to vector<16x96xf32>
    %211 = arith.addf %209, %210 : vector<16x96xf32>
    %c1_66 = arith.constant 1 : index
    %c0_67 = arith.constant 0 : index
    %c0_68 = arith.constant 0 : index
    %c0_69 = arith.constant 0 : index
    %212 = vector.load %arg5[%c1_66, %c0_67, %c0_68, %c0_69] : memref<2x4x8x32xbf16, #tpu.memory_space<vmem>>, vector<1x4x8x32xbf16>
    %213 = vector.shape_cast %212 : vector<1x4x8x32xbf16> to vector<4x8x32xbf16>
    %214 = vector.extract_strided_slice %211 {offsets = [0, 0], sizes = [16, 8], strides = [1, 1]} : vector<16x96xf32> to vector<16x8xf32>
    %215 = vector.shape_cast %214 : vector<16x8xf32> to vector<2x8x8xf32>
    %216 = vector.extract_strided_slice %211 {offsets = [0, 32], sizes = [16, 8], strides = [1, 1]} : vector<16x96xf32> to vector<16x8xf32>
    %217 = vector.shape_cast %216 : vector<16x8xf32> to vector<2x8x8xf32>
    %218 = vector.extract_strided_slice %211 {offsets = [0, 64], sizes = [16, 8], strides = [1, 1]} : vector<16x96xf32> to vector<16x8xf32>
    %219 = vector.shape_cast %218 : vector<16x8xf32> to vector<2x8x8xf32>
    %220 = vector.extract_strided_slice %215 {offsets = [0, 7, 0], sizes = [2, 1, 8], strides = [1, 1, 1]} : vector<2x8x8xf32> to vector<2x1x8xf32>
    %221 = arith.truncf %220 : vector<2x1x8xf32> to vector<2x1x8xbf16>
    %222 = arith.truncf %217 : vector<2x8x8xf32> to vector<2x8x8xbf16>
    "tpu.trace_start"() <{level = 10 : i32, message = "bqd,bkd->bqk"}> : () -> ()
    %cst_70 = arith.constant dense<0.000000e+00> : vector<2x1x8xf32>
    %223 = tpu.matmul %221, %222, %cst_70 {dimension_numbers = #tpu.dot_dimension_numbers<[2], [2], [1], [1], [0, 0, 0, 1, 1, 1], [0], [0]>} : vector<2x1x8xbf16>, vector<2x8x8xbf16>, vector<2x1x8xf32> -> vector<2x1x8xf32>
    "tpu.trace_stop"() : () -> ()
    %cst_71 = arith.constant dense<0xFF800000> : vector<2x1xf32>
    %224 = vector.multi_reduction <maximumf>, %223, %cst_71 [2] : vector<2x1x8xf32> to vector<2x1xf32>
    %225 = vector.shape_cast %224 : vector<2x1xf32> to vector<2x1x1xf32>
    %226 = vector.broadcast %225 : vector<2x1x1xf32> to vector<2x1x8xf32>
    %227 = arith.subf %223, %226 : vector<2x1x8xf32>
    %228 = math.exp %227 : vector<2x1x8xf32>
    %cst_72 = arith.constant dense<0.000000e+00> : vector<2x1xf32>
    %229 = vector.multi_reduction <add>, %228, %cst_72 [2] : vector<2x1x8xf32> to vector<2x1xf32>
    %230 = vector.shape_cast %229 : vector<2x1xf32> to vector<2x1x1xf32>
    %231 = tpu.reciprocal %230 {approx = true} : vector<2x1x1xf32> -> vector<2x1x1xf32>
    %232 = vector.broadcast %231 : vector<2x1x1xf32> to vector<2x1x8xf32>
    %233 = arith.mulf %228, %232 : vector<2x1x8xf32>
    %234 = arith.truncf %233 : vector<2x1x8xf32> to vector<2x1x8xbf16>
    %235 = arith.truncf %219 : vector<2x8x8xf32> to vector<2x8x8xbf16>
    "tpu.trace_start"() <{level = 10 : i32, message = "bqk,bkd->bqd"}> : () -> ()
    %cst_73 = arith.constant dense<0.000000e+00> : vector<2x1x8xf32>
    %236 = tpu.matmul %234, %235, %cst_73 {dimension_numbers = #tpu.dot_dimension_numbers<[2], [1], [1], [2], [0, 0, 0, 1, 1, 2], [0], [0]>} : vector<2x1x8xbf16>, vector<2x8x8xbf16>, vector<2x1x8xf32> -> vector<2x1x8xf32>
    "tpu.trace_stop"() : () -> ()
    %237 = vector.shape_cast %236 : vector<2x1x8xf32> to vector<2x8xf32>
    %238 = arith.truncf %237 : vector<2x8xf32> to vector<2x8xbf16>
    %239 = vector.extract_strided_slice %213 {offsets = [0, 0, 0], sizes = [1, 8, 32], strides = [1, 1, 1]} : vector<4x8x32xbf16> to vector<1x8x32xbf16>
    %240 = vector.shape_cast %239 : vector<1x8x32xbf16> to vector<8x32xbf16>
    %cst_74 = arith.constant dense<0.000000e+00> : vector<2x32xf32>
    %241 = tpu.matmul %238, %240, %cst_74 {dimension_numbers = #tpu.dot_dimension_numbers<[1], [0], [0], [1], [0, 0, 1, 1], [], []>} : vector<2x8xbf16>, vector<8x32xbf16>, vector<2x32xf32> -> vector<2x32xf32>
    %242 = vector.extract_strided_slice %211 {offsets = [0, 8], sizes = [16, 8], strides = [1, 1]} : vector<16x96xf32> to vector<16x8xf32>
    %243 = vector.shape_cast %242 : vector<16x8xf32> to vector<2x8x8xf32>
    %244 = vector.extract_strided_slice %211 {offsets = [0, 40], sizes = [16, 8], strides = [1, 1]} : vector<16x96xf32> to vector<16x8xf32>
    %245 = vector.shape_cast %244 : vector<16x8xf32> to vector<2x8x8xf32>
    %246 = vector.extract_strided_slice %211 {offsets = [0, 72], sizes = [16, 8], strides = [1, 1]} : vector<16x96xf32> to vector<16x8xf32>
    %247 = vector.shape_cast %246 : vector<16x8xf32> to vector<2x8x8xf32>
    %248 = vector.extract_strided_slice %243 {offsets = [0, 7, 0], sizes = [2, 1, 8], strides = [1, 1, 1]} : vector<2x8x8xf32> to vector<2x1x8xf32>
    %249 = arith.truncf %248 : vector<2x1x8xf32> to vector<2x1x8xbf16>
    %250 = arith.truncf %245 : vector<2x8x8xf32> to vector<2x8x8xbf16>
    "tpu.trace_start"() <{level = 10 : i32, message = "bqd,bkd->bqk"}> : () -> ()
    %cst_75 = arith.constant dense<0.000000e+00> : vector<2x1x8xf32>
    %251 = tpu.matmul %249, %250, %cst_75 {dimension_numbers = #tpu.dot_dimension_numbers<[2], [2], [1], [1], [0, 0, 0, 1, 1, 1], [0], [0]>} : vector<2x1x8xbf16>, vector<2x8x8xbf16>, vector<2x1x8xf32> -> vector<2x1x8xf32>
    "tpu.trace_stop"() : () -> ()
    %cst_76 = arith.constant dense<0xFF800000> : vector<2x1xf32>
    %252 = vector.multi_reduction <maximumf>, %251, %cst_76 [2] : vector<2x1x8xf32> to vector<2x1xf32>
    %253 = vector.shape_cast %252 : vector<2x1xf32> to vector<2x1x1xf32>
    %254 = vector.broadcast %253 : vector<2x1x1xf32> to vector<2x1x8xf32>
    %255 = arith.subf %251, %254 : vector<2x1x8xf32>
    %256 = math.exp %255 : vector<2x1x8xf32>
    %cst_77 = arith.constant dense<0.000000e+00> : vector<2x1xf32>
    %257 = vector.multi_reduction <add>, %256, %cst_77 [2] : vector<2x1x8xf32> to vector<2x1xf32>
    %258 = vector.shape_cast %257 : vector<2x1xf32> to vector<2x1x1xf32>
    %259 = tpu.reciprocal %258 {approx = true} : vector<2x1x1xf32> -> vector<2x1x1xf32>
    %260 = vector.broadcast %259 : vector<2x1x1xf32> to vector<2x1x8xf32>
    %261 = arith.mulf %256, %260 : vector<2x1x8xf32>
    %262 = arith.truncf %261 : vector<2x1x8xf32> to vector<2x1x8xbf16>
    %263 = arith.truncf %247 : vector<2x8x8xf32> to vector<2x8x8xbf16>
    "tpu.trace_start"() <{level = 10 : i32, message = "bqk,bkd->bqd"}> : () -> ()
    %cst_78 = arith.constant dense<0.000000e+00> : vector<2x1x8xf32>
    %264 = tpu.matmul %262, %263, %cst_78 {dimension_numbers = #tpu.dot_dimension_numbers<[2], [1], [1], [2], [0, 0, 0, 1, 1, 2], [0], [0]>} : vector<2x1x8xbf16>, vector<2x8x8xbf16>, vector<2x1x8xf32> -> vector<2x1x8xf32>
    "tpu.trace_stop"() : () -> ()
    %265 = vector.shape_cast %264 : vector<2x1x8xf32> to vector<2x8xf32>
    %266 = arith.truncf %265 : vector<2x8xf32> to vector<2x8xbf16>
    %267 = vector.extract_strided_slice %213 {offsets = [1, 0, 0], sizes = [1, 8, 32], strides = [1, 1, 1]} : vector<4x8x32xbf16> to vector<1x8x32xbf16>
    %268 = vector.shape_cast %267 : vector<1x8x32xbf16> to vector<8x32xbf16>
    %cst_79 = arith.constant dense<0.000000e+00> : vector<2x32xf32>
    %269 = tpu.matmul %266, %268, %cst_79 {dimension_numbers = #tpu.dot_dimension_numbers<[1], [0], [0], [1], [0, 0, 1, 1], [], []>} : vector<2x8xbf16>, vector<8x32xbf16>, vector<2x32xf32> -> vector<2x32xf32>
    %270 = arith.addf %241, %269 : vector<2x32xf32>
    %271 = vector.extract_strided_slice %211 {offsets = [0, 16], sizes = [16, 8], strides = [1, 1]} : vector<16x96xf32> to vector<16x8xf32>
    %272 = vector.shape_cast %271 : vector<16x8xf32> to vector<2x8x8xf32>
    %273 = vector.extract_strided_slice %211 {offsets = [0, 48], sizes = [16, 8], strides = [1, 1]} : vector<16x96xf32> to vector<16x8xf32>
    %274 = vector.shape_cast %273 : vector<16x8xf32> to vector<2x8x8xf32>
    %275 = vector.extract_strided_slice %211 {offsets = [0, 80], sizes = [16, 8], strides = [1, 1]} : vector<16x96xf32> to vector<16x8xf32>
    %276 = vector.shape_cast %275 : vector<16x8xf32> to vector<2x8x8xf32>
    %277 = vector.extract_strided_slice %272 {offsets = [0, 7, 0], sizes = [2, 1, 8], strides = [1, 1, 1]} : vector<2x8x8xf32> to vector<2x1x8xf32>
    %278 = arith.truncf %277 : vector<2x1x8xf32> to vector<2x1x8xbf16>
    %279 = arith.truncf %274 : vector<2x8x8xf32> to vector<2x8x8xbf16>
    "tpu.trace_start"() <{level = 10 : i32, message = "bqd,bkd->bqk"}> : () -> ()
    %cst_80 = arith.constant dense<0.000000e+00> : vector<2x1x8xf32>
    %280 = tpu.matmul %278, %279, %cst_80 {dimension_numbers = #tpu.dot_dimension_numbers<[2], [2], [1], [1], [0, 0, 0, 1, 1, 1], [0], [0]>} : vector<2x1x8xbf16>, vector<2x8x8xbf16>, vector<2x1x8xf32> -> vector<2x1x8xf32>
    "tpu.trace_stop"() : () -> ()
    %cst_81 = arith.constant dense<0xFF800000> : vector<2x1xf32>
    %281 = vector.multi_reduction <maximumf>, %280, %cst_81 [2] : vector<2x1x8xf32> to vector<2x1xf32>
    %282 = vector.shape_cast %281 : vector<2x1xf32> to vector<2x1x1xf32>
    %283 = vector.broadcast %282 : vector<2x1x1xf32> to vector<2x1x8xf32>
    %284 = arith.subf %280, %283 : vector<2x1x8xf32>
    %285 = math.exp %284 : vector<2x1x8xf32>
    %cst_82 = arith.constant dense<0.000000e+00> : vector<2x1xf32>
    %286 = vector.multi_reduction <add>, %285, %cst_82 [2] : vector<2x1x8xf32> to vector<2x1xf32>
    %287 = vector.shape_cast %286 : vector<2x1xf32> to vector<2x1x1xf32>
    %288 = tpu.reciprocal %287 {approx = true} : vector<2x1x1xf32> -> vector<2x1x1xf32>
    %289 = vector.broadcast %288 : vector<2x1x1xf32> to vector<2x1x8xf32>
    %290 = arith.mulf %285, %289 : vector<2x1x8xf32>
    %291 = arith.truncf %290 : vector<2x1x8xf32> to vector<2x1x8xbf16>
    %292 = arith.truncf %276 : vector<2x8x8xf32> to vector<2x8x8xbf16>
    "tpu.trace_start"() <{level = 10 : i32, message = "bqk,bkd->bqd"}> : () -> ()
    %cst_83 = arith.constant dense<0.000000e+00> : vector<2x1x8xf32>
    %293 = tpu.matmul %291, %292, %cst_83 {dimension_numbers = #tpu.dot_dimension_numbers<[2], [1], [1], [2], [0, 0, 0, 1, 1, 2], [0], [0]>} : vector<2x1x8xbf16>, vector<2x8x8xbf16>, vector<2x1x8xf32> -> vector<2x1x8xf32>
    "tpu.trace_stop"() : () -> ()
    %294 = vector.shape_cast %293 : vector<2x1x8xf32> to vector<2x8xf32>
    %295 = arith.truncf %294 : vector<2x8xf32> to vector<2x8xbf16>
    %296 = vector.extract_strided_slice %213 {offsets = [2, 0, 0], sizes = [1, 8, 32], strides = [1, 1, 1]} : vector<4x8x32xbf16> to vector<1x8x32xbf16>
    %297 = vector.shape_cast %296 : vector<1x8x32xbf16> to vector<8x32xbf16>
    %cst_84 = arith.constant dense<0.000000e+00> : vector<2x32xf32>
    %298 = tpu.matmul %295, %297, %cst_84 {dimension_numbers = #tpu.dot_dimension_numbers<[1], [0], [0], [1], [0, 0, 1, 1], [], []>} : vector<2x8xbf16>, vector<8x32xbf16>, vector<2x32xf32> -> vector<2x32xf32>
    %299 = arith.addf %270, %298 : vector<2x32xf32>
    %300 = vector.extract_strided_slice %211 {offsets = [0, 24], sizes = [16, 8], strides = [1, 1]} : vector<16x96xf32> to vector<16x8xf32>
    %301 = vector.shape_cast %300 : vector<16x8xf32> to vector<2x8x8xf32>
    %302 = vector.extract_strided_slice %211 {offsets = [0, 56], sizes = [16, 8], strides = [1, 1]} : vector<16x96xf32> to vector<16x8xf32>
    %303 = vector.shape_cast %302 : vector<16x8xf32> to vector<2x8x8xf32>
    %304 = vector.extract_strided_slice %211 {offsets = [0, 88], sizes = [16, 8], strides = [1, 1]} : vector<16x96xf32> to vector<16x8xf32>
    %305 = vector.shape_cast %304 : vector<16x8xf32> to vector<2x8x8xf32>
    %306 = vector.extract_strided_slice %301 {offsets = [0, 7, 0], sizes = [2, 1, 8], strides = [1, 1, 1]} : vector<2x8x8xf32> to vector<2x1x8xf32>
    %307 = arith.truncf %306 : vector<2x1x8xf32> to vector<2x1x8xbf16>
    %308 = arith.truncf %303 : vector<2x8x8xf32> to vector<2x8x8xbf16>
    "tpu.trace_start"() <{level = 10 : i32, message = "bqd,bkd->bqk"}> : () -> ()
    %cst_85 = arith.constant dense<0.000000e+00> : vector<2x1x8xf32>
    %309 = tpu.matmul %307, %308, %cst_85 {dimension_numbers = #tpu.dot_dimension_numbers<[2], [2], [1], [1], [0, 0, 0, 1, 1, 1], [0], [0]>} : vector<2x1x8xbf16>, vector<2x8x8xbf16>, vector<2x1x8xf32> -> vector<2x1x8xf32>
    "tpu.trace_stop"() : () -> ()
    %cst_86 = arith.constant dense<0xFF800000> : vector<2x1xf32>
    %310 = vector.multi_reduction <maximumf>, %309, %cst_86 [2] : vector<2x1x8xf32> to vector<2x1xf32>
    %311 = vector.shape_cast %310 : vector<2x1xf32> to vector<2x1x1xf32>
    %312 = vector.broadcast %311 : vector<2x1x1xf32> to vector<2x1x8xf32>
    %313 = arith.subf %309, %312 : vector<2x1x8xf32>
    %314 = math.exp %313 : vector<2x1x8xf32>
    %cst_87 = arith.constant dense<0.000000e+00> : vector<2x1xf32>
    %315 = vector.multi_reduction <add>, %314, %cst_87 [2] : vector<2x1x8xf32> to vector<2x1xf32>
    %316 = vector.shape_cast %315 : vector<2x1xf32> to vector<2x1x1xf32>
    %317 = tpu.reciprocal %316 {approx = true} : vector<2x1x1xf32> -> vector<2x1x1xf32>
    %318 = vector.broadcast %317 : vector<2x1x1xf32> to vector<2x1x8xf32>
    %319 = arith.mulf %314, %318 : vector<2x1x8xf32>
    %320 = arith.truncf %319 : vector<2x1x8xf32> to vector<2x1x8xbf16>
    %321 = arith.truncf %305 : vector<2x8x8xf32> to vector<2x8x8xbf16>
    "tpu.trace_start"() <{level = 10 : i32, message = "bqk,bkd->bqd"}> : () -> ()
    %cst_88 = arith.constant dense<0.000000e+00> : vector<2x1x8xf32>
    %322 = tpu.matmul %320, %321, %cst_88 {dimension_numbers = #tpu.dot_dimension_numbers<[2], [1], [1], [2], [0, 0, 0, 1, 1, 2], [0], [0]>} : vector<2x1x8xbf16>, vector<2x8x8xbf16>, vector<2x1x8xf32> -> vector<2x1x8xf32>
    "tpu.trace_stop"() : () -> ()
    %323 = vector.shape_cast %322 : vector<2x1x8xf32> to vector<2x8xf32>
    %324 = arith.truncf %323 : vector<2x8xf32> to vector<2x8xbf16>
    %325 = vector.extract_strided_slice %213 {offsets = [3, 0, 0], sizes = [1, 8, 32], strides = [1, 1, 1]} : vector<4x8x32xbf16> to vector<1x8x32xbf16>
    %326 = vector.shape_cast %325 : vector<1x8x32xbf16> to vector<8x32xbf16>
    %cst_89 = arith.constant dense<0.000000e+00> : vector<2x32xf32>
    %327 = tpu.matmul %324, %326, %cst_89 {dimension_numbers = #tpu.dot_dimension_numbers<[1], [0], [0], [1], [0, 0, 1, 1], [], []>} : vector<2x8xbf16>, vector<8x32xbf16>, vector<2x32xf32> -> vector<2x32xf32>
    %328 = arith.addf %299, %327 : vector<2x32xf32>
    %329 = vector.broadcast %205 : vector<1x32xf32> to vector<2x32xf32>
    %330 = arith.addf %328, %329 : vector<2x32xf32>
    %331 = vector.shape_cast %203 : vector<16x32xf32> to vector<2x8x32xf32>
    %332 = vector.extract_strided_slice %331 {offsets = [0, 7, 0], sizes = [2, 1, 32], strides = [1, 1, 1]} : vector<2x8x32xf32> to vector<2x1x32xf32>
    %333 = vector.shape_cast %332 : vector<2x1x32xf32> to vector<2x32xf32>
    %334 = arith.addf %333, %330 : vector<2x32xf32>
    %c0_90 = arith.constant 0 : index
    %c1280 = arith.constant 1280 : index
    %335 = vector.load %arg9[%c0_90, %c1280] : memref<1x2176xf32, #tpu.memory_space<vmem>>, vector<1x32xf32>
    %c0_91 = arith.constant 0 : index
    %c1408 = arith.constant 1408 : index
    %336 = vector.load %arg9[%c0_91, %c1408] : memref<1x2176xf32, #tpu.memory_space<vmem>>, vector<1x32xf32>
    %cst_92 = arith.constant dense<0.000000e+00> : vector<2xf32>
    %337 = vector.multi_reduction <add>, %334, %cst_92 [1] : vector<2x32xf32> to vector<2xf32>
    %338 = vector.shape_cast %337 : vector<2xf32> to vector<2x1xf32>
    %cst_93 = arith.constant 3.200000e+01 : f32
    %339 = vector.broadcast %cst_93 : f32 to vector<2x1xf32>
    %340 = arith.divf %338, %339 : vector<2x1xf32>
    %341 = arith.mulf %334, %334 : vector<2x32xf32>
    %cst_94 = arith.constant dense<0.000000e+00> : vector<2xf32>
    %342 = vector.multi_reduction <add>, %341, %cst_94 [1] : vector<2x32xf32> to vector<2xf32>
    %343 = vector.shape_cast %342 : vector<2xf32> to vector<2x1xf32>
    %cst_95 = arith.constant 3.200000e+01 : f32
    %344 = vector.broadcast %cst_95 : f32 to vector<2x1xf32>
    %345 = arith.divf %343, %344 : vector<2x1xf32>
    %346 = arith.mulf %340, %340 : vector<2x1xf32>
    %347 = arith.subf %345, %346 : vector<2x1xf32>
    %348 = vector.broadcast %340 : vector<2x1xf32> to vector<2x32xf32>
    %349 = arith.subf %334, %348 : vector<2x32xf32>
    %cst_96 = arith.constant 9.99999974E-6 : f32
    %350 = vector.broadcast %cst_96 : f32 to vector<2x1xf32>
    %351 = arith.addf %347, %350 : vector<2x1xf32>
    %352 = math.rsqrt %351 : vector<2x1xf32>
    %353 = vector.broadcast %352 : vector<2x1xf32> to vector<2x32xf32>
    %354 = arith.mulf %349, %353 : vector<2x32xf32>
    %355 = vector.broadcast %335 : vector<1x32xf32> to vector<2x32xf32>
    %356 = arith.mulf %354, %355 : vector<2x32xf32>
    %357 = vector.broadcast %336 : vector<1x32xf32> to vector<2x32xf32>
    %358 = arith.addf %356, %357 : vector<2x32xf32>
    %c0_97 = arith.constant 0 : index
    %c1536 = arith.constant 1536 : index
    %359 = vector.load %arg9[%c0_97, %c1536] : memref<1x2176xf32, #tpu.memory_space<vmem>>, vector<1x64xf32>
    %c0_98 = arith.constant 0 : index
    %c1664 = arith.constant 1664 : index
    %360 = vector.load %arg9[%c0_98, %c1664] : memref<1x2176xf32, #tpu.memory_space<vmem>>, vector<1x32xf32>
    %361 = arith.truncf %358 : vector<2x32xf32> to vector<2x32xbf16>
    %c1_99 = arith.constant 1 : index
    %c0_100 = arith.constant 0 : index
    %c0_101 = arith.constant 0 : index
    %362 = vector.load %arg6[%c1_99, %c0_100, %c0_101] : memref<2x32x64xbf16, #tpu.memory_space<vmem>>, vector<1x32x64xbf16>
    %363 = vector.shape_cast %362 : vector<1x32x64xbf16> to vector<32x64xbf16>
    %cst_102 = arith.constant dense<0.000000e+00> : vector<2x64xf32>
    %364 = tpu.matmul %361, %363, %cst_102 {dimension_numbers = #tpu.dot_dimension_numbers<[1], [0], [0], [1], [0, 0, 1, 1], [], []>} : vector<2x32xbf16>, vector<32x64xbf16>, vector<2x64xf32> -> vector<2x64xf32>
    %365 = vector.broadcast %359 : vector<1x64xf32> to vector<2x64xf32>
    %366 = arith.addf %364, %365 : vector<2x64xf32>
    %cst_103 = arith.constant 0.000000e+00 : f32
    %367 = vector.broadcast %cst_103 : f32 to vector<2x64xf32>
    %368 = arith.maximumf %366, %367 : vector<2x64xf32>
    %369 = arith.truncf %368 : vector<2x64xf32> to vector<2x64xbf16>
    %c1_104 = arith.constant 1 : index
    %c0_105 = arith.constant 0 : index
    %c0_106 = arith.constant 0 : index
    %370 = vector.load %arg7[%c1_104, %c0_105, %c0_106] : memref<2x64x32xbf16, #tpu.memory_space<vmem>>, vector<1x64x32xbf16>
    %371 = vector.shape_cast %370 : vector<1x64x32xbf16> to vector<64x32xbf16>
    %cst_107 = arith.constant dense<0.000000e+00> : vector<2x32xf32>
    %372 = tpu.matmul %369, %371, %cst_107 {dimension_numbers = #tpu.dot_dimension_numbers<[1], [0], [0], [1], [0, 0, 1, 1], [], []>} : vector<2x64xbf16>, vector<64x32xbf16>, vector<2x32xf32> -> vector<2x32xf32>
    %373 = vector.broadcast %360 : vector<1x32xf32> to vector<2x32xf32>
    %374 = arith.addf %372, %373 : vector<2x32xf32>
    %375 = arith.addf %358, %374 : vector<2x32xf32>
    %c0_108 = arith.constant 0 : index
    %c1792 = arith.constant 1792 : index
    %376 = vector.load %arg9[%c0_108, %c1792] : memref<1x2176xf32, #tpu.memory_space<vmem>>, vector<1x32xf32>
    %c0_109 = arith.constant 0 : index
    %c1920 = arith.constant 1920 : index
    %377 = vector.load %arg9[%c0_109, %c1920] : memref<1x2176xf32, #tpu.memory_space<vmem>>, vector<1x32xf32>
    %cst_110 = arith.constant dense<0.000000e+00> : vector<2xf32>
    %378 = vector.multi_reduction <add>, %375, %cst_110 [1] : vector<2x32xf32> to vector<2xf32>
    %379 = vector.shape_cast %378 : vector<2xf32> to vector<2x1xf32>
    %cst_111 = arith.constant 3.200000e+01 : f32
    %380 = vector.broadcast %cst_111 : f32 to vector<2x1xf32>
    %381 = arith.divf %379, %380 : vector<2x1xf32>
    %382 = arith.mulf %375, %375 : vector<2x32xf32>
    %cst_112 = arith.constant dense<0.000000e+00> : vector<2xf32>
    %383 = vector.multi_reduction <add>, %382, %cst_112 [1] : vector<2x32xf32> to vector<2xf32>
    %384 = vector.shape_cast %383 : vector<2xf32> to vector<2x1xf32>
    %cst_113 = arith.constant 3.200000e+01 : f32
    %385 = vector.broadcast %cst_113 : f32 to vector<2x1xf32>
    %386 = arith.divf %384, %385 : vector<2x1xf32>
    %387 = arith.mulf %381, %381 : vector<2x1xf32>
    %388 = arith.subf %386, %387 : vector<2x1xf32>
    %389 = vector.broadcast %381 : vector<2x1xf32> to vector<2x32xf32>
    %390 = arith.subf %375, %389 : vector<2x32xf32>
    %cst_114 = arith.constant 9.99999974E-6 : f32
    %391 = vector.broadcast %cst_114 : f32 to vector<2x1xf32>
    %392 = arith.addf %388, %391 : vector<2x1xf32>
    %393 = math.rsqrt %392 : vector<2x1xf32>
    %394 = vector.broadcast %393 : vector<2x1xf32> to vector<2x32xf32>
    %395 = arith.mulf %390, %394 : vector<2x32xf32>
    %396 = vector.broadcast %376 : vector<1x32xf32> to vector<2x32xf32>
    %397 = arith.mulf %395, %396 : vector<2x32xf32>
    %398 = vector.broadcast %377 : vector<1x32xf32> to vector<2x32xf32>
    %399 = arith.addf %397, %398 : vector<2x32xf32>
    %cst_115 = arith.constant 0.000000e+00 : f32
    %400 = vector.broadcast %cst_115 : f32 to vector<6x32xf32>
    %401 = tpu.concatenate %399, %400 in 0 : vector<2x32xf32>, vector<6x32xf32> -> vector<8x32xf32>
    %c0_116 = arith.constant 0 : index
    %c2048 = arith.constant 2048 : index
    %402 = vector.load %arg9[%c0_116, %c2048] : memref<1x2176xf32, #tpu.memory_space<vmem>>, vector<1x128xf32>
    %403 = arith.truncf %401 : vector<8x32xf32> to vector<8x32xbf16>
    %c0_117 = arith.constant 0 : index
    %c0_118 = arith.constant 0 : index
    %404 = vector.load %arg8[%c0_117, %c0_118] : memref<32x128xbf16, #tpu.memory_space<vmem>>, vector<32x128xbf16>
    %cst_119 = arith.constant dense<0.000000e+00> : vector<8x128xf32>
    %405 = tpu.matmul %403, %404, %cst_119 {dimension_numbers = #tpu.dot_dimension_numbers<[1], [0], [0], [1], [0, 0, 1, 1], [], []>} : vector<8x32xbf16>, vector<32x128xbf16>, vector<8x128xf32> -> vector<8x128xf32>
    %406 = vector.broadcast %402 : vector<1x128xf32> to vector<8x128xf32>
    %407 = arith.addf %405, %406 : vector<8x128xf32>
    %c0_120 = arith.constant 0 : index
    %c0_121 = arith.constant 0 : index
    %408 = vector.load %arg10[%c0_120, %c0_121] : memref<8x128xf32, #tpu.memory_space<vmem>>, vector<8x128xf32>
    tpu.vector_store %arg10[%c0_120, %c0_121], %407 {strides = array<i32>} : memref<8x128xf32, #tpu.memory_space<vmem>>, vector<8x128xf32>,
    return
  }
  func.func @transform_0(%arg0: i32) -> (i32, i32) {
    %c0_i32 = arith.constant 0 : i32
    %c0_i32_0 = arith.constant 0 : i32
    %c0_i32_1 = arith.constant 0 : i32
    return %c0_i32, %c0_i32_0 : i32, i32
  }
  func.func @transform_1(%arg0: i32) -> (i32, i32) {
    %c0_i32 = arith.constant 0 : i32
    %c0_i32_0 = arith.constant 0 : i32
    %c0_i32_1 = arith.constant 0 : i32
    return %c0_i32, %c0_i32_0 : i32, i32
  }
  func.func @transform_2(%arg0: i32) -> (i32, i32) {
    %c0_i32 = arith.constant 0 : i32
    %c0_i32_0 = arith.constant 0 : i32
    %c0_i32_1 = arith.constant 0 : i32
    return %c0_i32, %c0_i32_0 : i32, i32
  }
  func.func @transform_3(%arg0: i32) -> (i32, i32, i32) {
    %c0_i32 = arith.constant 0 : i32
    %c0_i32_0 = arith.constant 0 : i32
    %c0_i32_1 = arith.constant 0 : i32
    %c0_i32_2 = arith.constant 0 : i32
    return %c0_i32, %c0_i32_0, %c0_i32_1 : i32, i32, i32
  }
  func.func @transform_4(%arg0: i32) -> (i32, i32, i32, i32) {
    %c0_i32 = arith.constant 0 : i32
    %c0_i32_0 = arith.constant 0 : i32
    %c0_i32_1 = arith.constant 0 : i32
    %c0_i32_2 = arith.constant 0 : i32
    %c0_i32_3 = arith.constant 0 : i32
    return %c0_i32, %c0_i32_0, %c0_i32_1, %c0_i32_2 : i32, i32, i32, i32
  }
  func.func @transform_5(%arg0: i32) -> (i32, i32, i32) {
    %c0_i32 = arith.constant 0 : i32
    %c0_i32_0 = arith.constant 0 : i32
    %c0_i32_1 = arith.constant 0 : i32
    %c0_i32_2 = arith.constant 0 : i32
    return %c0_i32, %c0_i32_0, %c0_i32_1 : i32, i32, i32
  }
  func.func @transform_6(%arg0: i32) -> (i32, i32, i32) {
    %c0_i32 = arith.constant 0 : i32
    %c0_i32_0 = arith.constant 0 : i32
    %c0_i32_1 = arith.constant 0 : i32
    %c0_i32_2 = arith.constant 0 : i32
    return %c0_i32, %c0_i32_0, %c0_i32_1 : i32, i32, i32
  }
  func.func @transform_7(%arg0: i32) -> (i32, i32) {
    %c0_i32 = arith.constant 0 : i32
    %c0_i32_0 = arith.constant 0 : i32
    %c0_i32_1 = arith.constant 0 : i32
    return %c0_i32, %c0_i32_0 : i32, i32
  }
  func.func @transform_8(%arg0: i32) -> (i32, i32) {
    %c0_i32 = arith.constant 0 : i32
    %c0_i32_0 = arith.constant 0 : i32
    %c0_i32_1 = arith.constant 0 : i32
    return %c0_i32, %c0_i32_0 : i32, i32
  }
  func.func @transform_9(%arg0: i32) -> (i32, i32) {
    %c0_i32 = arith.constant 0 : i32
    %c0_i32_0 = arith.constant 0 : i32
    %c0_i32_1 = arith.constant 0 : i32
    return %c0_i32, %c0_i32_0 : i32, i32
  }
}

</mosaic_0001>

<bundles_post_ra>
// kernel: transformer_char_model_forward.1
= control target key start
LH: loop header
LB: loop body
LE: loop exit
PB: predicated region body
PF: predicated region fallthrough
CT: control target
= control target key end

     0   :  { %14 = vsyncpa [#allocation3], 0  ;;  %s2779_s0 = inlined_call_operand.vmem [shape: s32[16,1], index: 0, kind: input, shape index: {}]   ;;  %s2780_s1 = inlined_call_operand.hbm [shape: bf16[16,32], index: 1, kind: input, shape index: {}]   ;;  %s2781_s2 = inlined_call_operand.hbm [shape: f32[8,32], index: 2, kind: input, shape index: {}]   ;;  %s2782_s3 = inlined_call_operand.vmem [shape: bf16[2,32,96], index: 3, kind: input, shape index: {}]   ;;  %s2783_s4 = inlined_call_operand.vmem [shape: bf16[2,4,8,32], index: 4, kind: input, shape index: {}]   ;;  %s2784_s5 = inlined_call_operand.vmem [shape: bf16[2,32,64], index: 5, kind: input, shape index: {}]   ;;  %s2785_s6 = inlined_call_operand.vmem [shape: bf16[2,64,32], index: 6, kind: input, shape index: {}]   ;;  %s2786_s7 = inlined_call_operand.hbm [shape: bf16[32,128], index: 7, kind: input, shape index: {}]   ;;  %s2787_s8 = inlined_call_operand.vmem [shape: f32[1,2176], index: 8, kind: input, shape index: {}]   ;;  %s2788_s9 = inlined_call_operand.vmem [shape: f32[8,128], index: 9, kind: output, shape index: {}]  }
   0x1   :  { %15 = vsyncpa [#allocation5], 0  ;;  %s36_s11 = sshll.u32 %s2781_s2, 4  ;;  %s2255_s12 = smov [#allocation4]   ;;  %s37_s11 = int_to_ptr.hbm [resolvable:$true] %s36_s11 }
   0x2   :  { %s38_s13 = sshll.u32 %s2255_s12, 4  ;;  %s22_s16 = sshll.u32 %s2780_s1, 4  ;;  %s39_s13 = int_to_ptr.vmem [resolvable:$true] %s38_s13  ;;  %s23_s16 = int_to_ptr.hbm [resolvable:$true] %s22_s16 }
   0x3   :  { %41 = dma.hbm_to_vmem [thread:$0]  %s37_s11, 128, %s39_s13, [#allocation5]  }
   0x4   :  { %s2256_s17 = smov [#allocation2]   ;;  %s2257_s19 = smov 64  }
   0x5   :  { %s24_s18 = sshll.u32 %s2256_s17, 4  ;;  %s2258_s20 = smov 4   ;;  %s25_s18 = int_to_ptr.vmem [resolvable:$true] %s24_s18 }
   0x6   :  { %30 = dma.hbm_to_vmem [thread:$0]  %s23_s16, 128, %s25_s18, [#allocation3], %s2257_s19, %s2257_s19, %s2258_s20  }
   0x7   :  { %s54_s22 = sshll.u32 %s2786_s7, 4  ;;  %s2259_s23 = smov [#allocation6]   ;;  %s55_s22 = int_to_ptr.hbm [resolvable:$true] %s54_s22 }
   0x8   :  { %s56_s24 = sshll.u32 %s2259_s23, 4  ;;  %s57_s24 = int_to_ptr.vmem [resolvable:$true] %s56_s24 }
   0x9   :  { %62 = dma.hbm_to_vmem [thread:$0]  %s55_s22, 256, %s57_s24, [#allocation5], %s2257_s19, %s2257_s19, %s2258_s20  }
   0xa   :  { %2251 = dma.done.wait [#allocation3], 128  }
   0xb   :  { %2252 = vsyncadd [#allocation3], 4294967168 }
   0xc   :  { %2253 = dma.done.wait [#allocation5], 384  }
   0xd   :  { %2254 = vsyncadd [#allocation5], 4294966912  ;;  %v2260_v0 = vmov 0   ;;  %v78_v1 = vld [vmem:[%s2779_s0] sm:$0xff]  ;;  %v79_v2 = vld [vmem:[%s2779_s0 + $0x8] sm:$0xff]  ;;  %v80_v4 = vlaneseq  ;;  %v2261_v8 = vmov 0.0  }
   0xe   :  { %2079 = vset.pattern.permute.xlu0 %v2260_v0  ;;  %v2042_v3 = vld [vmem:[#allocation2] sm:$0xff]  ;;  %vm103_vm2 = vcmask 130048   ;;  %v2044_v12 = vld [vmem:[%s2782_s3 + $0x8] sm:$0xff]  ;;  %vm146_vm3 = vcmask 261120   ;;  %s2262_s11 = smov 120   ;;  %s2263_s12 = smov 96  }
   0xf   :  { %83 = vperm.xlu0 %2079, %v78_v1   ;;  %114 = vmatpush.bf16.msra.mxu0 %v2042_v3  ;;  %v81_v6 = vand.u32 127, %v80_v4  ;;  %v2043_v13 = vld [vmem:[%s2782_s3] sm:$0xff]  ;;  %v121_v15 = vld [vmem:[#allocation4] sm:$0xff]  ;;  %s2264_s13 = smov 88   ;;  %vm175_vm4 = vcmask 64512   ;;  %s2265_s14 = smov 112  }
  0x10   :  { %156 = vmatpush.bf16.msra.mxu1 %v2044_v12  ;;  %v2080_v20 = vld [vmem:[%s2787_s8] ss:$0 sm:$0xff]  ;;  %vm248_vm5 = vcmask 1043456   ;;  %s2266_s15 = smov 56   ;;  %s2267_s16 = smov 80   ;;  %vm861_vm13 = vcmask 523264  }
  0x11   :  { %s2268_s17 = smov 48   ;;  %s2269_s18 = smov 72  }
  0x12   :  { %s2270_s20 = smov 104   ;;  %s2271_s24 = smov 40  }
  0x14   :  { %157 = vmatpush.bf16.msra.mxu1 %v2043_v13 }
  0x17   :  { %86 = vperm.xlu0 %2079, %v79_v2  }
  0x81   :  { %v84_v5 = vpop.permute.xlu0 %83 }
  0x82   :  { %vm88_vm0 = vcmp.eq.s32.totalorder %v84_v5, %v81_v6 }
  0x83   :  { %v1896_v9 = vsel %vm88_vm0, 1.0, %v2261_v8 }
  0x89   :  { %v87_v7 = vpop.permute.xlu0 %86 }
  0x8a   :  { %vm89_vm1 = vcmp.eq.s32.totalorder %v87_v7, %v81_v6 }
  0x8b   :  { %v1897_v10 = vsel %vm89_vm1, 1.0, %v2261_v8 }
  0x8c   :  { %v94_v11 = vpack.c.bf16 %v1897_v10, %v1896_v9 }
  0x8e   :  { %1902 = vmatmul.msk.bf16.vlgmr.msra.gmra.mxu0 %vm103_vm2, %v94_v11 }
 0x10b   :  { %v116_v14 = vpop.f32.mrf.mxu0 }
 0x10c   :  { %v2348_v17 = vadd.f32 %v121_v15, %v116_v14 }
 0x113   :  { %v118_v16 = vpop.f32.mrf.mxu0 }
 0x114   :  { %v2350_v18 = vadd.f32 %v121_v15, %v118_v16 }
 0x116   :  { %v126_v19 = vpack.c.bf16 %v2350_v18, %v2348_v17 }
 0x118   :  { %1911 = vmatmul.msk.bf16.vlgmr.msra.gmra.mxu1 %vm146_vm3, %v126_v19 }
 0x195   :  { %v159_v21 = vpop.f32.mrf.mxu1 }
 0x196   :  { %v160_v22 = vadd.f32 %v2080_v20, %v159_v21 }
 0x198   :  { %v168_v23 = vpack.c.bf16 %v160_v22, %v160_v22 }
 0x19a   :  { %v171_v24 = vunpack.c.l.b16 %v168_v23 }
 0x19c   :  { %v2358_v25 = vpack.c.b16 %v171_v24, %v171_v24 }
 0x19d   :  { %v161_v26 = vpop.f32.mrf.mxu1 }
 0x19e   :  { %v162_v27 = vadd.f32 %v2080_v20, %v161_v26  ;;  %287 = vrot.lane.b32.xlu2 %v2358_v25, %s2262_s11  ;;  %173 = vrot.lane.b32.xlu1 %v2358_v25, %s2263_s12 }
 0x1a0   :  { %v169_v28 = vpack.c.bf16 %v162_v27, %v162_v27 }
 0x1a2   :  { %v196_v29 = vunpack.c.l.b16 %v169_v28 }
 0x1a4   :  { %v2364_v30 = vpack.c.b16 %v196_v29, %v196_v29 }
 0x1a6   :  { %312 = vrot.lane.b32.xlu0 %v2364_v30, %s2264_s13  ;;  %198 = vrot.lane.b32.xlu2 %v2364_v30, %s2263_s12 }
 0x1a7   :  { %289 = vrot.lane.b32.xlu1 %v2358_v25, %s2264_s13 }
 0x1af   :  { %310 = vrot.lane.b32.xlu1 %v2364_v30, %s2262_s11 }
 0x1f8   :  { %v288_v31 = vpop.permute.xlu2 %287 }
 0x200   :  { %v199_v32 = vpop.permute.xlu2 %198 }
 0x201   :  { %v204_v33 = vsel %vm175_vm4, %v199_v32, 0 }
 0x202   :  { %213 = vmatpush.bf16.xpose.msra.mxu3 %v204_v33 }
 0x209   :  { %1913 = vmatmul.msk.bf16.vlgmr.msra.gmra.mxu3 %vm175_vm4, %v169_v28 }
 0x210   :  { %v174_v34 = vpop.permute.xlu1 %173 }
 0x211   :  { %v180_v35 = vsel %vm175_vm4, %v174_v34, 0 }
 0x212   :  { %189 = vmatpush.bf16.xpose.msra.mxu2 %v180_v35 }
 0x218   :  { %v313_v36 = vpop.permute.xlu0 %312 }
 0x219   :  { %v290_v37 = vpop.permute.xlu1 %289  ;;  %1912 = vmatmul.msk.bf16.vlgmr.msra.gmra.mxu2 %vm175_vm4, %v168_v23  ;;  %v318_v38 = vsel %vm175_vm4, %v313_v36, 0 }
 0x21a   :  { %v295_v39 = vsel %vm175_vm4, %v290_v37, 0  ;;  %327 = vmatpush.bf16.xpose.msrb.mxu3 %v318_v38 }
 0x21b   :  { %304 = vmatpush.bf16.xpose.msrb.mxu2 %v295_v39 }
 0x221   :  { %v311_v40 = vpop.permute.xlu1 %310 }
 0x222   :  { %1917 = vmatmul.msk.bf16.vlgmr.msrb.gmra.mxu3 %vm175_vm4, %v311_v40 }
 0x229   :  { %1916 = vmatmul.msk.bf16.vlgmr.msrb.gmra.mxu2 %vm175_vm4, %v288_v31 }
 0x28c   :  { %v215_v41 = vpop.f32.mrf.mxu3 }
 0x28d   :  { %v222_v51 = vsel %vm175_vm4, %v215_v41, -inf }
 0x294   :  { %v217_v42 = vpop.f32.mrf.mxu3 }
 0x29c   :  { %v191_v43 = vpop.f32.mrf.mxu2 }
 0x29d   :  { %v219_v44 = vsel %vm175_vm4, %v191_v43, -inf }
 0x29e   :  { %220 = vmax.xlane.f32.xlu2 %v219_v44 }
 0x2a4   :  { %v193_v45 = vpop.f32.mrf.mxu2 }
 0x2a5   :  { %v2383_v46 = vpop.f32.mrf.mxu3 }
 0x2a6   :  { %v336_v4 = vsel %vm175_vm4, %v2383_v46, -inf }
 0x2ac   :  { %v306_v47 = vpop.f32.mrf.mxu2 }
 0x2ad   :  { %v331_v48 = vpop.f32.mrf.mxu3  ;;  %v333_v49 = vsel %vm175_vm4, %v306_v47, -inf }
 0x2ae   :  { %334 = vmax.xlane.f32.xlu0 %v333_v49 }
 0x2b4   :  { %v308_v50 = vpop.f32.mrf.mxu2 }
 0x2b6   :  { %243 = vrot.lane.b32.xlu2 %v2358_v25, %s2257_s19 }
 0x2be   :  { %440 = vrot.lane.b32.xlu2 %v2358_v25, %s2265_s14 }
 0x2e7   :  { %223 = vmax.xlane.f32.xlu2 %v222_v51 }
 0x2ff   :  { %265 = vrot.lane.b32.xlu2 %v2364_v30, %s2257_s19 }
 0x307   :  { %463 = vrot.lane.b32.xlu2 %v2364_v30, %s2265_s14 }
 0x311   :  { %v221_v52 = vpop.xlane.xlu2 %220 }
 0x312   :  { %v225_v53 = vsub.f32 %v191_v43, %v221_v52  ;;  %v164_v43 = vld [vmem:[%s2783_s4] sm:$0xf] }
 0x313   :  { %v424_v44 = vsel %vm248_vm5, %v164_v43, 0 }
 0x314   :  { %v227_v54 = vmul.f32 1.442695, %v225_v53  ;;  %433 = vmatpush.bf16.msra.mxu3 %v424_v44 }
 0x316   :  { %2097 = vpow2.f32 %v227_v54 }
 0x319   :  { %v244_v55 = vpop.permute.xlu2 %243 }
 0x31a   :  { %v250_v56 = vsel %vm248_vm5, %v244_v55, 0 }
 0x31b   :  { %259 = vmatpush.bf16.msrb.mxu0 %v250_v56 }
 0x31c   :  { %v2098_v57 = vpop.eup %2097 }
 0x31d   :  { %v231_v58 = vsel %vm175_vm4, %v2098_v57, 0.0 }
 0x31e   :  { %232 = vadd.xlane.f32.xlu1 %v231_v58 }
 0x321   :  { %v335_v59 = vpop.xlane.xlu0 %334  ;;  %v441_v0 = vpop.permute.xlu2 %440 }
 0x322   :  { %v339_v60 = vsub.f32 %v306_v47, %v335_v59 }
 0x324   :  { %v341_v61 = vmul.f32 1.442695, %v339_v60 }
 0x326   :  { %2099 = vpow2.f32 %v341_v61 }
 0x32c   :  { %v2100_v62 = vpop.eup %2099 }
 0x32d   :  { %v345_v63 = vsel %vm175_vm4, %v2100_v62, 0.0 }
 0x32e   :  { %346 = vadd.xlane.f32.xlu0 %v345_v63 }
 0x337   :  { %357 = vrot.lane.b32.xlu1 %v2358_v25, %s2266_s15 }
 0x342   :  { %442 = vrot.lane.b32.xlu0 %v2358_v25, %s2267_s16 }
 0x35a   :  { %v224_v1 = vpop.xlane.xlu2 %223 }
 0x35b   :  { %v226_v2 = vsub.f32 %v215_v41, %v224_v1 }
 0x35d   :  { %v229_v3 = vmul.f32 1.442695, %v226_v2 }
 0x35f   :  { %2101 = vpow2.f32 %v229_v3 }
 0x361   :  { %337 = vmax.xlane.f32.xlu1 %v336_v4 }
 0x362   :  { %v266_v5 = vpop.permute.xlu2 %265 }
 0x363   :  { %v271_v6 = vsel %vm248_vm5, %v266_v5, 0 }
 0x364   :  { %280 = vmatpush.bf16.msrb.mxu1 %v271_v6 }
 0x365   :  { %v2102_v7 = vpop.eup %2101 }
 0x366   :  { %v234_v8 = vsel %vm175_vm4, %v2102_v7, 0.0 }
 0x36a   :  { %v464_v56 = vpop.permute.xlu2 %463 }
 0x36c   :  { %235 = vadd.xlane.f32.xlu0 %v234_v8 }
 0x380   :  { %378 = vrot.lane.b32.xlu0 %v2364_v30, %s2266_s15 }
 0x391   :  { %v233_v9 = vpop.xlane.xlu1 %232 }
 0x392   :  { %2103 = vrcp.f32 %v233_v9 }
 0x398   :  { %v2104_v10 = vpop.eup %2103 }
 0x399   :  { %v239_v11 = vmul.f32 %v2104_v10, %v2098_v57 }
 0x39b   :  { %v241_v12 = vpack.c.bf16 %v239_v11, %v239_v11 }
 0x39d   :  { %1914 = vmatmul.msk.bf16.vlgmr.msrb.gmra.mxu0 %vm175_vm4, %v241_v12 }
 0x3a1   :  { %v347_v13 = vpop.xlane.xlu0 %346 }
 0x3a2   :  { %2105 = vrcp.f32 %v347_v13 }
 0x3a8   :  { %v2106_v14 = vpop.eup %2105 }
 0x3a9   :  { %v353_v15 = vmul.f32 %v2106_v14, %v2100_v62  ;;  %v358_v16 = vpop.permute.xlu1 %357 }
 0x3aa   :  { %v363_v19 = vsel %vm248_vm5, %v358_v16, 0 }
 0x3ab   :  { %v355_v20 = vpack.c.bf16 %v353_v15, %v353_v15  ;;  %372 = vmatpush.bf16.msra.mxu0 %v363_v19 }
 0x3ae   :  { %1918 = vmatmul.msk.bf16.vlgmr.msra.gmra.mxu0 %vm175_vm4, %v355_v20 }
 0x3b4   :  { %v443_v21 = vpop.permute.xlu0 %442 }
 0x3b5   :  { %v448_v22 = vsel %vm175_vm4, %v443_v21, 0 }
 0x3b6   :  { %457 = vmatpush.bf16.xpose.msrb.mxu0 %v448_v22 }
 0x3be   :  { %1922 = vmatmul.msk.bf16.vlgmr.msrb.gmra.mxu0 %vm175_vm4, %v441_v0 }
 0x3d4   :  { %v338_v23 = vpop.xlane.xlu1 %337 }
 0x3d5   :  { %v340_v24 = vsub.f32 %v2383_v46, %v338_v23  ;;  %v165_v46 = vld [vmem:[%s2783_s4 + $0x4] sm:$0xf] }
 0x3d6   :  { %v404_v47 = vsel %vm248_vm5, %v165_v46, 0 }
 0x3d7   :  { %v343_v26 = vmul.f32 1.442695, %v340_v24  ;;  %413 = vmatpush.bf16.msra.mxu2 %v404_v47 }
 0x3d9   :  { %2107 = vpow2.f32 %v343_v26  ;;  %v166_v26 = vld [vmem:[%s2783_s4 + $0x8] sm:$0xf] }
 0x3df   :  { %v2108_v27 = vpop.eup %2107  ;;  %v236_v28 = vpop.xlane.xlu0 %235 }
 0x3e0   :  { %2109 = vrcp.f32 %v236_v28  ;;  %v348_v29 = vsel %vm175_vm4, %v2108_v27, 0.0  ;;  %v557_v28 = vsel %vm248_vm5, %v166_v26, 0 }
 0x3e1   :  { %349 = vadd.xlane.f32.xlu1 %v348_v29  ;;  %566 = vmatpush.bf16.msra.mxu0 %v557_v28 }
 0x3e6   :  { %v2110_v31 = vpop.eup %2109 }
 0x3e7   :  { %v240_v32 = vmul.f32 %v2110_v31, %v2102_v7 }
 0x3e9   :  { %v242_v33 = vpack.c.bf16 %v240_v32, %v240_v32 }
 0x3eb   :  { %1915 = vmatmul.msk.bf16.vlgmr.msrb.gmra.mxu1 %vm175_vm4, %v242_v33 }
 0x3f2   :  { %v379_v34 = vpop.permute.xlu0 %378 }
 0x3f3   :  { %v384_v35 = vsel %vm248_vm5, %v379_v34, 0 }
 0x3f4   :  { %393 = vmatpush.bf16.msra.mxu1 %v384_v35 }
 0x3fa   :  { %465 = vrot.lane.b32.xlu1 %v2364_v30, %s2267_s16 }
 0x402   :  { %510 = vrot.lane.b32.xlu1 %v2358_v25, %s2268_s17 }
 0x40a   :  { %577 = vrot.lane.b32.xlu1 %v2358_v25, %s2269_s18 }
 0x412   :  { %600 = vrot.lane.b32.xlu1 %v2364_v30, %s2269_s18 }
 0x41a   :  { %v261_v36 = vpop.f32.mrf.mxu0  ;;  %575 = vrot.lane.b32.xlu1 %v2358_v25, %s2270_s20 }
 0x422   :  { %v263_v37 = vpop.f32.mrf.mxu0 }
 0x42b   :  { %v374_v38 = vpop.f32.mrf.mxu0 }
 0x433   :  { %v376_v39 = vpop.f32.mrf.mxu0 }
 0x43b   :  { %v459_v40 = vpop.f32.mrf.mxu0 }
 0x43c   :  { %v486_v41 = vsel %vm175_vm4, %v459_v40, -inf }
 0x43d   :  { %487 = vmax.xlane.f32.xlu0 %v486_v41 }
 0x443   :  { %v461_v42 = vpop.f32.mrf.mxu0 }
 0x451   :  { %598 = vrot.lane.b32.xlu0 %v2364_v30, %s2270_s20 }
 0x454   :  { %v350_v45 = vpop.xlane.xlu1 %349 }
 0x455   :  { %2111 = vrcp.f32 %v350_v45 }
 0x45b   :  { %v2112_v48 = vpop.eup %2111 }
 0x45c   :  { %v354_v49 = vmul.f32 %v2112_v48, %v2108_v27 }
 0x45e   :  { %v356_v50 = vpack.c.bf16 %v354_v49, %v354_v49 }
 0x460   :  { %1919 = vmatmul.msk.bf16.vlgmr.msra.gmra.mxu1 %vm175_vm4, %v356_v50 }
 0x468   :  { %v282_v51 = vpop.f32.mrf.mxu1 }
 0x469   :  { %v286_v52 = vpack.c.bf16 %v282_v51, %v261_v36 }
 0x46b   :  { %1921 = vmatmul.msk.bf16.vlgmr.msra.gmra.mxu3 %vm175_vm4, %v286_v52 }
 0x46c   :  { %v466_v53 = vpop.permute.xlu1 %465 }
 0x46d   :  { %v471_v54 = vsel %vm175_vm4, %v466_v53, 0 }
 0x46e   :  { %480 = vmatpush.bf16.xpose.msrb.mxu1 %v471_v54 }
 0x470   :  { %v284_v55 = vpop.f32.mrf.mxu1 }
 0x474   :  { %v511_v57 = vpop.permute.xlu1 %510 }
 0x475   :  { %v516_v58 = vsel %vm248_vm5, %v511_v57, 0  ;;  %1923 = vmatmul.msk.bf16.vlgmr.msrb.gmra.mxu1 %vm175_vm4, %v464_v56 }
 0x476   :  { %525 = vmatpush.bf16.msrb.mxu2 %v516_v58 }
 0x47c   :  { %v578_v59 = vpop.permute.xlu1 %577 }
 0x47d   :  { %v583_v60 = vsel %vm175_vm4, %v578_v59, 0 }
 0x47e   :  { %592 = vmatpush.bf16.xpose.msra.mxu1 %v583_v60 }
 0x484   :  { %v601_v61 = vpop.permute.xlu1 %600 }
 0x485   :  { %v606_v6 = vsel %vm175_vm4, %v601_v61, 0 }
 0x48c   :  { %v576_v62 = vpop.permute.xlu1 %575 }
 0x48d   :  { %1927 = vmatmul.msk.bf16.vlgmr.msra.gmra.mxu1 %vm175_vm4, %v576_v62 }
 0x4b0   :  { %v488_v63 = vpop.xlane.xlu0 %487 }
 0x4b1   :  { %v492_v0 = vsub.f32 %v459_v40, %v488_v63 }
 0x4b3   :  { %v494_v1 = vmul.f32 1.442695, %v492_v0 }
 0x4b5   :  { %2113 = vpow2.f32 %v494_v1 }
 0x4bb   :  { %v2114_v2 = vpop.eup %2113 }
 0x4bc   :  { %v498_v3 = vsel %vm175_vm4, %v2114_v2, 0.0 }
 0x4bd   :  { %499 = vadd.xlane.f32.xlu2 %v498_v3 }
 0x4c3   :  { %v599_v20 = vpop.permute.xlu0 %598 }
 0x4dd   :  { %v395_v4 = vpop.f32.mrf.mxu1 }
 0x4de   :  { %v399_v5 = vpack.c.bf16 %v395_v4, %v374_v38 }
 0x4e0   :  { %1920 = vmatmul.msk.bf16.vlgmr.msra.gmra.mxu2 %vm175_vm4, %v399_v5 }
 0x4e1   :  { %615 = vmatpush.bf16.xpose.msra.mxu2 %v606_v6 }
 0x4e5   :  { %v397_v7 = vpop.f32.mrf.mxu1 }
 0x4e6   :  { %v167_v7 = vld [vmem:[%s2783_s4 + $0xc] sm:$0xf] }
 0x4ee   :  { %v435_v54 = vpop.f32.mrf.mxu3 }
 0x4f2   :  { %v482_v8 = vpop.f32.mrf.mxu1 }
 0x4f3   :  { %v489_v9 = vsel %vm175_vm4, %v482_v8, -inf }
 0x4f4   :  { %490 = vmax.xlane.f32.xlu1 %v489_v9 }
 0x4f6   :  { %v437_v55 = vpop.f32.mrf.mxu3 }
 0x4fa   :  { %v484_v10 = vpop.f32.mrf.mxu1 }
 0x50a   :  { %v594_v11 = vpop.f32.mrf.mxu1 }
 0x50b   :  { %v621_v12 = vsel %vm175_vm4, %v594_v11, -inf }
 0x50c   :  { %622 = vmax.xlane.f32.xlu0 %v621_v12 }
 0x512   :  { %v596_v13 = vpop.f32.mrf.mxu1 }
 0x520   :  { %666 = vrot.lane.b32.xlu0 %v2364_v30, %s2271_s24 }
 0x530   :  { %v500_v14 = vpop.xlane.xlu2 %499 }
 0x531   :  { %2115 = vrcp.f32 %v500_v14 }
 0x537   :  { %v2116_v15 = vpop.eup %2115 }
 0x538   :  { %v506_v16 = vmul.f32 %v2116_v15, %v2114_v2  ;;  %v2081_v15 = vld [vmem:[%s2787_s8 + $0x1] ss:$0 sm:$0xff] }
 0x53a   :  { %v508_v19 = vpack.c.bf16 %v506_v16, %v506_v16 }
 0x53c   :  { %1924 = vmatmul.msk.bf16.vlgmr.msrb.gmra.mxu2 %vm175_vm4, %v508_v19 }
 0x54c   :  { %1928 = vmatmul.msk.bf16.vlgmr.msra.gmra.mxu2 %vm175_vm4, %v599_v20 }
 0x563   :  { %v415_v37 = vpop.f32.mrf.mxu2 }
 0x564   :  { %v436_v4 = vadd.f32 %v435_v54, %v415_v37 }
 0x567   :  { %v491_v21 = vpop.xlane.xlu1 %490 }
 0x568   :  { %v493_v22 = vsub.f32 %v482_v8, %v491_v21  ;;  %v692_v8 = vsel %vm248_vm5, %v167_v7, 0 }
 0x569   :  { %701 = vmatpush.bf16.msrb.mxu1 %v692_v8 }
 0x56a   :  { %v496_v23 = vmul.f32 1.442695, %v493_v22 }
 0x56b   :  { %v417_v38 = vpop.f32.mrf.mxu2 }
 0x56c   :  { %2117 = vpow2.f32 %v496_v23  ;;  %v438_v21 = vadd.f32 %v437_v55, %v417_v38 }
 0x572   :  { %v2118_v24 = vpop.eup %2117 }
 0x573   :  { %v501_v27 = vsel %vm175_vm4, %v2118_v24, 0.0 }
 0x574   :  { %502 = vadd.xlane.f32.xlu2 %v501_v27 }
 0x57f   :  { %v623_v29 = vpop.xlane.xlu0 %622 }
 0x580   :  { %v627_v31 = vsub.f32 %v594_v11, %v623_v29 }
 0x582   :  { %v629_v32 = vmul.f32 1.442695, %v627_v31 }
 0x584   :  { %2119 = vpow2.f32 %v629_v32 }
 0x58a   :  { %v2120_v33 = vpop.eup %2119 }
 0x58b   :  { %v633_v34 = vsel %vm175_vm4, %v2120_v33, 0.0 }
 0x58c   :  { %634 = vadd.xlane.f32.xlu1 %v633_v34  ;;  %531 = vrot.lane.b32.xlu2 %v2364_v30, %s2268_s17 }
 0x592   :  { %v667_v35 = vpop.permute.xlu0 %666 }
 0x593   :  { %v672_v36 = vsel %vm248_vm5, %v667_v35, 0  ;;  %v2272_v35 = vmov 32.0  }
 0x594   :  { %681 = vmatpush.bf16.msrb.mxu0 %v672_v36 }
 0x5bf   :  { %v527_v39 = vpop.f32.mrf.mxu2 }
 0x5c7   :  { %v529_v40 = vpop.f32.mrf.mxu2 }
 0x5cf   :  { %v617_v41 = vpop.f32.mrf.mxu2 }
 0x5d0   :  { %v624_v42 = vsel %vm175_vm4, %v617_v41, -inf }
 0x5d1   :  { %625 = vmax.xlane.f32.xlu2 %v624_v42 }
 0x5d7   :  { %v619_v43 = vpop.f32.mrf.mxu2 }
 0x5e7   :  { %v503_v44 = vpop.xlane.xlu2 %502 }
 0x5e8   :  { %2121 = vrcp.f32 %v503_v44 }
 0x5ee   :  { %v2122_v45 = vpop.eup %2121 }
 0x5ef   :  { %v507_v46 = vmul.f32 %v2122_v45, %v2118_v24  ;;  %v532_v47 = vpop.permute.xlu2 %531 }
 0x5f0   :  { %v537_v30 = vsel %vm248_vm5, %v532_v47, 0 }
 0x5f1   :  { %v509_v48 = vpack.c.bf16 %v507_v46, %v507_v46  ;;  %546 = vmatpush.bf16.msrb.mxu3 %v537_v30  ;;  %v2046_v46 = vld [vmem:[%s2784_s5 + $0x8] sm:$0xff]  ;;  %v2045_v30 = vld [vmem:[%s2784_s5] sm:$0xff] }
 0x5f2   :  { %815 = vmatpush.bf16.msrb.mxu2 %v2046_v46 }
 0x5f4   :  { %1925 = vmatmul.msk.bf16.vlgmr.msrb.gmra.mxu3 %vm175_vm4, %v509_v48 }
 0x5f6   :  { %816 = vmatpush.bf16.msrb.mxu2 %v2045_v30 }
 0x5ff   :  { %v635_v59 = vpop.xlane.xlu1 %634 }
 0x644   :  { %v626_v49 = vpop.xlane.xlu2 %625 }
 0x645   :  { %v628_v50 = vsub.f32 %v617_v41, %v626_v49 }
 0x647   :  { %v631_v51 = vmul.f32 1.442695, %v628_v50 }
 0x649   :  { %2123 = vpow2.f32 %v631_v51 }
 0x64f   :  { %v2124_v52 = vpop.eup %2123 }
 0x650   :  { %v636_v53 = vsel %vm175_vm4, %v2124_v52, 0.0 }
 0x651   :  { %637 = vadd.xlane.f32.xlu1 %v636_v53 }
 0x66a   :  { %645 = vrot.lane.b32.xlu1 %v2358_v25, %s2271_s24 }
 0x677   :  { %v548_v56 = vpop.f32.mrf.mxu3 }
 0x678   :  { %v552_v57 = vpack.c.bf16 %v548_v56, %v527_v39 }
 0x67a   :  { %1926 = vmatmul.msk.bf16.vlgmr.msra.gmra.mxu0 %vm175_vm4, %v552_v57 }
 0x67f   :  { %v550_v58 = vpop.f32.mrf.mxu3 }
 0x6c4   :  { %v638_v60 = vpop.xlane.xlu1 %637 }
 0x6c5   :  { %2125 = vrcp.f32 %v638_v60 }
 0x6c6   :  { %2127 = vrcp.f32 %v635_v59 }
 0x6c7   :  { %2129 = vrcp.f32 %v2272_v35 }
 0x6cb   :  { %v2126_v61 = vpop.eup %2125 }
 0x6cc   :  { %v642_v62 = vmul.f32 %v2126_v61, %v2124_v52  ;;  %v2128_v0 = vpop.eup %2127 }
 0x6cd   :  { %v641_v1 = vmul.f32 %v2128_v0, %v2120_v33  ;;  %v2130_v36 = vpop.eup %2129 }
 0x6ce   :  { %v644_v63 = vpack.c.bf16 %v642_v62, %v642_v62  ;;  %v726_v37 = vmul.f32 32.0, %v2130_v36  ;;  %vm730_vm6 = vweird.f32 %v2130_v36 }
 0x6cf   :  { %v643_v3 = vpack.c.bf16 %v641_v1, %v641_v1 }
 0x6d0   :  { %1930 = vmatmul.msk.bf16.vlgmr.msrb.gmra.mxu0 %vm175_vm4, %v644_v63  ;;  %v727_v38 = vsub.f32 1.0, %v726_v37 }
 0x6d2   :  { %v728_v39 = vmul.f32 %v2130_v36, %v727_v38 }
 0x6d4   :  { %v729_v40 = vadd.f32 %v2130_v36, %v728_v39 }
 0x6d6   :  { %v2492_v41 = vsel %vm730_vm6, %v2130_v36, %v729_v40 }
 0x6dc   :  { %v646_v2 = vpop.permute.xlu1 %645 }
 0x6dd   :  { %v651_v25 = vsel %vm248_vm5, %v646_v2, 0 }
 0x6de   :  { %660 = vmatpush.bf16.msra.mxu3 %v651_v25 }
 0x6e1   :  { %1929 = vmatmul.msk.bf16.vlgmr.msra.gmra.mxu3 %vm175_vm4, %v643_v3 }
 0x6f7   :  { %v568_v5 = vpop.f32.mrf.mxu0 }
 0x6f8   :  { %v573_v6 = vadd.f32 %v568_v5, %v436_v4  ;;  %v2082_v4 = vld [vmem:[%s2787_s8 + $0x2] ss:$0 sm:$0xff] }
 0x6ff   :  { %v570_v9 = vpop.f32.mrf.mxu0 }
 0x700   :  { %v574_v23 = vadd.f32 %v570_v9, %v438_v21  ;;  %v2047_v21 = vld [vmem:[%s2785_s6] sm:$0xff] }
 0x74d   :  { %v683_v10 = vpop.f32.mrf.mxu0 }
 0x755   :  { %v685_v11 = vpop.f32.mrf.mxu0 }
 0x756   :  { %v2083_v11 = vld [vmem:[%s2787_s8 + $0x3] ss:$0 sm:$0xff] }
 0x764   :  { %v662_v12 = vpop.f32.mrf.mxu3 }
 0x765   :  { %v687_v13 = vpack.c.bf16 %v683_v10, %v662_v12 }
 0x767   :  { %1931 = vmatmul.msk.bf16.vlgmr.msrb.gmra.mxu1 %vm175_vm4, %v687_v13 }
 0x76c   :  { %v664_v14 = vpop.f32.mrf.mxu3 }
 0x7e4   :  { %v703_v16 = vpop.f32.mrf.mxu1 }
 0x7e5   :  { %v708_v19 = vadd.f32 %v703_v16, %v573_v6  ;;  %v2050_v16 = vld [vmem:[%s2785_s6 + $0x18] sm:$0xff] }
 0x7e6   :  { %869 = vmatpush.bf16.msrb.mxu3 %v2050_v16 }
 0x7e7   :  { %v713_v20 = vadd.f32 %v2081_v15, %v708_v19  ;;  %v2049_v19 = vld [vmem:[%s2785_s6 + $0x10] sm:$0xff] }
 0x7e9   :  { %v2482_v22 = vadd.f32 %v713_v20, %v2348_v17  ;;  %v2048_v20 = vld [vmem:[%s2785_s6 + $0x8] sm:$0xff] }
 0x7ea   :  { %870 = vmatpush.bf16.msrb.mxu3 %v2049_v19 }
 0x7eb   :  { %v719_v24 = vsel %vm146_vm3, %v2482_v22, 0.0  ;;  %v734_v26 = vmul.f32 %v2482_v22, %v2482_v22 }
 0x7ec   :  { %720 = vadd.xlane.f32.xlu2 %v719_v24  ;;  %v705_v27 = vpop.f32.mrf.mxu1 }
 0x7ed   :  { %v709_v28 = vadd.f32 %v705_v27, %v574_v23  ;;  %v736_v29 = vsel %vm146_vm3, %v734_v26, 0.0  ;;  %v2084_v23 = vld [vmem:[%s2787_s8 + $0x4] ss:$0 sm:$0xff] }
 0x7ee   :  { %737 = vadd.xlane.f32.xlu1 %v736_v29  ;;  %871 = vmatpush.bf16.msrb.mxu3 %v2048_v20 }
 0x7ef   :  { %v714_v31 = vadd.f32 %v2081_v15, %v709_v28 }
 0x7f1   :  { %v716_v32 = vadd.f32 %v714_v31, %v2350_v18 }
 0x7f2   :  { %872 = vmatpush.bf16.msrb.mxu3 %v2047_v21  ;;  %v2088_v21 = vld [vmem:[%s2787_s8 + $0x8] ss:$0 sm:$0xff] }
 0x7f3   :  { %v722_v33 = vsel %vm146_vm3, %v716_v32, 0.0  ;;  %v735_v17 = vmul.f32 %v716_v32, %v716_v32 }
 0x7f4   :  { %723 = vadd.xlane.f32.xlu0 %v722_v33 }
 0x7f5   :  { %v739_v34 = vsel %vm146_vm3, %v735_v17, 0.0 }
 0x7f6   :  { %740 = vadd.xlane.f32.xlu2 %v739_v34 }
 0x85f   :  { %v721_v42 = vpop.xlane.xlu2 %720 }
 0x860   :  { %v732_v18 = vmul.f32 %v2492_v41, %v721_v42 }
 0x861   :  { %v738_v43 = vpop.xlane.xlu1 %737 }
 0x862   :  { %v744_v44 = vmul.f32 %v732_v18, %v732_v18  ;;  %v742_v45 = vmul.f32 %v738_v43, %v2492_v41  ;;  %v748_v25 = vsub.f32 %v2482_v22, %v732_v18 }
 0x864   :  { %v746_v47 = vsub.f32 %v742_v45, %v744_v44 }
 0x866   :  { %v750_v48 = vadd.f32 1e-05, %v746_v47 }
 0x867   :  { %v724_v49 = vpop.xlane.xlu0 %723 }
 0x868   :  { %2131 = vrsqrt.f32 %v750_v48  ;;  %v733_v50 = vmul.f32 %v2492_v41, %v724_v49  ;;  %vm758_vm8 = vweird.f32 %v750_v48 }
 0x869   :  { %v741_v51 = vpop.xlane.xlu2 %740 }
 0x86a   :  { %v745_v52 = vmul.f32 %v733_v50, %v733_v50  ;;  %v743_v53 = vmul.f32 %v741_v51, %v2492_v41  ;;  %v749_v7 = vsub.f32 %v716_v32, %v733_v50  ;;  %v2085_v32 = vld [vmem:[%s2787_s8 + $0x5] ss:$0 sm:$0xff]  ;;  %v2052_v51 = vld [vmem:[%s2782_s3 + $0x18] sm:$0xff] }
 0x86b   :  { %973 = vmatpush.bf16.msra.mxu0 %v2052_v51 }
 0x86c   :  { %v747_v54 = vsub.f32 %v743_v53, %v745_v52  ;;  %v2051_v52 = vld [vmem:[%s2782_s3 + $0x10] sm:$0xff] }
 0x86e   :  { %v2132_v55 = vpop.eup %2131  ;;  %v751_v56 = vadd.f32 1e-05, %v747_v54 }
 0x86f   :  { %v753_v57 = vmul.f32 %v2132_v55, %v750_v48  ;;  %vm759_vm7 = vweird.f32 %v2132_v55  ;;  %974 = vmatpush.bf16.msra.mxu0 %v2051_v52 }
 0x870   :  { %2133 = vrsqrt.f32 %v751_v56  ;;  %vm760_vm9 = vmor %vm758_vm8, %vm759_vm7  ;;  %vm768_vm11 = vweird.f32 %v751_v56  ;;  %vm1044_vm7 = vcmask 57344   ;;  %vm1232_vm8 = vcmask 1041409  }
 0x871   :  { %v754_v58 = vmul.f32 %v2132_v55, %v753_v57 }
 0x873   :  { %v755_v59 = vmul.f32 0.5, %v754_v58 }
 0x875   :  { %v756_v60 = vsub.f32 1.5, %v755_v59 }
 0x876   :  { %v2134_v61 = vpop.eup %2133 }
 0x877   :  { %v757_v62 = vmul.f32 %v2132_v55, %v756_v60  ;;  %v763_v63 = vmul.f32 %v2134_v61, %v751_v56  ;;  %vm769_vm10 = vweird.f32 %v2134_v61 }
 0x878   :  { %vm770_vm12 = vmor %vm768_vm11, %vm769_vm10 }
 0x879   :  { %v764_v0 = vmul.f32 %v2134_v61, %v763_v63  ;;  %v761_v1 = vsel %vm760_vm9, %v2132_v55, %v757_v62  ;;  %vm1584_vm9 = vcmask 253952  }
 0x87a   :  { %v772_v5 = vmul.f32 %v761_v1, %v748_v25 }
 0x87b   :  { %v765_v2 = vmul.f32 0.5, %v764_v0 }
 0x87c   :  { %v777_v9 = vmul.f32 %v2082_v4, %v772_v5 }
 0x87d   :  { %v766_v3 = vsub.f32 1.5, %v765_v2 }
 0x87e   :  { %v782_v13 = vadd.f32 %v2083_v11, %v777_v9 }
 0x87f   :  { %v767_v6 = vmul.f32 %v2134_v61, %v766_v3 }
 0x881   :  { %v771_v8 = vsel %vm770_vm12, %v2134_v61, %v767_v6 }
 0x882   :  { %v773_v10 = vmul.f32 %v771_v8, %v749_v7  ;;  %v2086_v7 = vld [vmem:[%s2787_s8 + $0x6] ss:$0 sm:$0xff] }
 0x884   :  { %v778_v12 = vmul.f32 %v2082_v4, %v773_v10 }
 0x886   :  { %v783_v14 = vadd.f32 %v2083_v11, %v778_v12 }
 0x888   :  { %v786_v15 = vpack.c.bf16 %v783_v14, %v782_v13 }
 0x88a   :  { %1940 = vmatmul.msk.bf16.vlgmr.msrb.gmra.mxu2 %vm146_vm3, %v786_v15 }
 0x90d   :  { %v818_v22 = vpop.f32.mrf.mxu2 }
 0x90e   :  { %v819_v24 = vadd.f32 %v2084_v23, %v818_v22 }
 0x910   :  { %v823_v28 = vmax.f32 %v819_v24, 0.0 }
 0x915   :  { %v820_v26 = vpop.f32.mrf.mxu2 }
 0x916   :  { %v821_v27 = vadd.f32 %v2084_v23, %v820_v26 }
 0x918   :  { %v824_v29 = vmax.f32 %v821_v27, 0.0 }
 0x91a   :  { %v825_v31 = vpack.c.bf16 %v824_v29, %v823_v28 }
 0x91c   :  { %1957 = vmatmul.msk.bf16.vlgmr.msrb.gmra.mxu3 %vm861_vm13, %v825_v31 }
 0x99f   :  { %v874_v33 = vpop.f32.mrf.mxu3 }
 0x9a0   :  { %v875_v17 = vadd.f32 %v2085_v32, %v874_v33 }
 0x9a2   :  { %v879_v34 = vadd.f32 %v875_v17, %v782_v13 }
 0x9a4   :  { %v883_v35 = vsel %vm146_vm3, %v879_v34, 0.0  ;;  %v891_v36 = vmul.f32 %v879_v34, %v879_v34 }
 0x9a5   :  { %884 = vadd.xlane.f32.xlu2 %v883_v35 }
 0x9a6   :  { %v893_v39 = vsel %vm146_vm3, %v891_v36, 0.0 }
 0x9a7   :  { %v876_v37 = vpop.f32.mrf.mxu3 }
 0x9a8   :  { %v877_v38 = vadd.f32 %v2085_v32, %v876_v37 }
 0x9aa   :  { %v880_v40 = vadd.f32 %v877_v38, %v783_v14  ;;  %v2087_v14 = vld [vmem:[%s2787_s8 + $0x7] ss:$0 sm:$0xff] }
 0x9ac   :  { %v886_v42 = vsel %vm146_vm3, %v880_v40, 0.0  ;;  %v892_v18 = vmul.f32 %v880_v40, %v880_v40 }
 0x9ad   :  { %894 = vadd.xlane.f32.xlu2 %v893_v39 }
 0x9ae   :  { %v896_v43 = vsel %vm146_vm3, %v892_v18, 0.0 }
 0x9b5   :  { %887 = vadd.xlane.f32.xlu2 %v886_v42 }
 0x9bd   :  { %897 = vadd.xlane.f32.xlu2 %v896_v43 }
 0xa18   :  { %v885_v44 = vpop.xlane.xlu2 %884 }
 0xa19   :  { %v889_v45 = vmul.f32 %v885_v44, %v2492_v41 }
 0xa1b   :  { %v901_v47 = vmul.f32 %v889_v45, %v889_v45  ;;  %v905_v5 = vsub.f32 %v879_v34, %v889_v45 }
 0xa20   :  { %v895_v46 = vpop.xlane.xlu2 %894 }
 0xa21   :  { %v899_v30 = vmul.f32 %v895_v46, %v2492_v41 }
 0xa23   :  { %v903_v48 = vsub.f32 %v899_v30, %v901_v47 }
 0xa25   :  { %v907_v49 = vadd.f32 1e-05, %v903_v48 }
 0xa27   :  { %2135 = vrsqrt.f32 %v907_v49  ;;  %vm915_vm15 = vweird.f32 %v907_v49 }
 0xa28   :  { %v888_v50 = vpop.xlane.xlu2 %887 }
 0xa29   :  { %v890_v54 = vmul.f32 %v888_v50, %v2492_v41 }
 0xa2b   :  { %v902_v57 = vmul.f32 %v890_v54, %v890_v54  ;;  %v906_v10 = vsub.f32 %v880_v40, %v890_v54 }
 0xa2d   :  { %v2136_v53 = vpop.eup %2135 }
 0xa2e   :  { %v910_v55 = vmul.f32 %v2136_v53, %v907_v49  ;;  %vm916_vm14 = vweird.f32 %v2136_v53 }
 0xa2f   :  { %vm917_vm0 = vmor %vm915_vm15, %vm916_vm14 }
 0xa30   :  { %v898_v56 = vpop.xlane.xlu2 %897  ;;  %v911_v59 = vmul.f32 %v2136_v53, %v910_v55 }
 0xa31   :  { %v900_v58 = vmul.f32 %v898_v56, %v2492_v41 }
 0xa32   :  { %v912_v62 = vmul.f32 0.5, %v911_v59 }
 0xa33   :  { %v904_v60 = vsub.f32 %v900_v58, %v902_v57 }
 0xa34   :  { %v913_v63 = vsub.f32 1.5, %v912_v62 }
 0xa35   :  { %v908_v61 = vadd.f32 1e-05, %v904_v60 }
 0xa36   :  { %v914_v1 = vmul.f32 %v2136_v53, %v913_v63 }
 0xa37   :  { %2137 = vrsqrt.f32 %v908_v61  ;;  %vm925_vm2 = vweird.f32 %v908_v61 }
 0xa38   :  { %v918_v3 = vsel %vm917_vm0, %v2136_v53, %v914_v1 }
 0xa39   :  { %v929_v8 = vmul.f32 %v918_v3, %v905_v5 }
 0xa3b   :  { %v934_v12 = vmul.f32 %v2086_v7, %v929_v8 }
 0xa3d   :  { %v2138_v0 = vpop.eup %2137  ;;  %v2551_v16 = vadd.f32 %v2087_v14, %v934_v12 }
 0xa3e   :  { %v920_v2 = vmul.f32 %v2138_v0, %v908_v61  ;;  %vm926_vm1 = vweird.f32 %v2138_v0 }
 0xa3f   :  { %vm927_vm6 = vmor %vm925_vm2, %vm926_vm1 }
 0xa40   :  { %v921_v25 = vmul.f32 %v2138_v0, %v920_v2 }
 0xa42   :  { %v922_v4 = vmul.f32 0.5, %v921_v25 }
 0xa44   :  { %v923_v6 = vsub.f32 1.5, %v922_v4 }
 0xa46   :  { %v924_v9 = vmul.f32 %v2138_v0, %v923_v6 }
 0xa48   :  { %v928_v11 = vsel %vm927_vm6, %v2138_v0, %v924_v9 }
 0xa49   :  { %v930_v13 = vmul.f32 %v928_v11, %v906_v10 }
 0xa4b   :  { %v935_v15 = vmul.f32 %v2086_v7, %v930_v13 }
 0xa4d   :  { %v2553_v19 = vadd.f32 %v2087_v14, %v935_v15 }
 0xa4f   :  { %v943_v20 = vpack.c.bf16 %v2553_v19, %v2551_v16 }
 0xa51   :  { %1970 = vmatmul.msk.bf16.vlgmr.msra.gmra.mxu0 %vm146_vm3, %v943_v20 }
 0xace   :  { %v976_v22 = vpop.f32.mrf.mxu0 }
 0xacf   :  { %v977_v23 = vadd.f32 %v2088_v21, %v976_v22 }
 0xad1   :  { %v986_v24 = vpack.c.bf16 %v977_v23, %v977_v23 }
 0xad3   :  { %v989_v26 = vunpack.c.l.b16 %v986_v24 }
 0xad5   :  { %v2561_v27 = vpack.c.b16 %v989_v26, %v989_v26 }
 0xad6   :  { %v978_v28 = vpop.f32.mrf.mxu0 }
 0xad7   :  { %v979_v29 = vadd.f32 %v2088_v21, %v978_v28  ;;  %1115 = vrot.lane.b32.xlu1 %v2561_v27, %s2264_s13  ;;  %995 = vrot.lane.b32.xlu0 %v2561_v27, %s2263_s12  ;;  %v992_v31 = vshrl.u32 %v2561_v27, 16 }
 0xad9   :  { %v987_v32 = vpack.c.bf16 %v979_v29, %v979_v29  ;;  %v2568_v33 = vrot.slane %v992_v31, 3 }
 0xadb   :  { %v1017_v17 = vunpack.c.l.b16 %v987_v32  ;;  %1113 = vrot.lane.b32.xlu2 %v2568_v33, %s2262_s11 }
 0xadd   :  { %v2572_v34 = vpack.c.b16 %v1017_v17, %v1017_v17 }
 0xadf   :  { %1138 = vrot.lane.b32.xlu1 %v2572_v34, %s2264_s13  ;;  %1023 = vrot.lane.b32.xlu0 %v2572_v34, %s2263_s12  ;;  %v1020_v35 = vshrl.u32 %v2572_v34, 16 }
 0xae1   :  { %v2579_v36 = vrot.slane %v1020_v35, 3 }
 0xae3   :  { %1136 = vrot.lane.b32.xlu2 %v2579_v36, %s2262_s11 }
 0xb35   :  { %v1114_v45 = vpop.permute.xlu2 %1113 }
 0xb3d   :  { %v1137_v46 = vpop.permute.xlu2 %1136 }
 0xb49   :  { %v1116_v37 = vpop.permute.xlu1 %1115  ;;  %v996_v38 = vpop.permute.xlu0 %995 }
 0xb4a   :  { %v1121_v39 = vsel %vm175_vm4, %v1116_v37, 0  ;;  %v1001_v40 = vsel %vm175_vm4, %v996_v38, 0 }
 0xb4b   :  { %1010 = vmatpush.bf16.xpose.msra.mxu1 %v1001_v40 }
 0xb51   :  { %v1139_v42 = vpop.permute.xlu1 %1138  ;;  %v1024_v18 = vpop.permute.xlu0 %1023 }
 0xb52   :  { %v1144_v43 = vsel %vm175_vm4, %v1139_v42, 0  ;;  %v1029_v44 = vsel %vm175_vm4, %v1024_v18, 0  ;;  %1975 = vmatmul.msk.bf16.vlgmr.msra.gmra.mxu1 %vm175_vm4, %v2568_v33 }
 0xb53   :  { %1130 = vmatpush.bf16.xpose.msrb.mxu1 %v1121_v39  ;;  %1038 = vmatpush.bf16.xpose.msra.mxu2 %v1029_v44 }
 0xb5a   :  { %1976 = vmatmul.msk.bf16.vlgmr.msra.gmra.mxu2 %vm175_vm4, %v2579_v36 }
 0xb5b   :  { %1153 = vmatpush.bf16.xpose.msrb.mxu2 %v1144_v43 }
 0xb62   :  { %1979 = vmatmul.msk.bf16.vlgmr.msrb.gmra.mxu1 %vm175_vm4, %v1114_v45 }
 0xb6a   :  { %1980 = vmatmul.msk.bf16.vlgmr.msrb.gmra.mxu2 %vm175_vm4, %v1137_v46 }
 0xbcf   :  { %v1012_v47 = vpop.f32.mrf.mxu1 }
 0xbd0   :  { %v1045_v30 = vsel %vm1044_vm7, %v1012_v47, -inf }
 0xbd1   :  { %1046 = vmax.xlane.f32.xlu0 %v1045_v30 }
 0xbd7   :  { %v1014_v48 = vpop.f32.mrf.mxu1 }
 0xbdd   :  { %v1040_v49 = vpop.f32.mrf.mxu2 }
 0xbde   :  { %v1048_v56 = vsel %vm1044_vm7, %v1040_v49, -inf }
 0xbdf   :  { %v1132_v50 = vpop.f32.mrf.mxu1 }
 0xbe0   :  { %v1159_v51 = vsel %vm1044_vm7, %v1132_v50, -inf }
 0xbe1   :  { %1160 = vmax.xlane.f32.xlu1 %v1159_v51 }
 0xbe5   :  { %v1042_v52 = vpop.f32.mrf.mxu2  ;;  %1069 = vrot.lane.b32.xlu0 %v2561_v27, %s2257_s19 }
 0xbe7   :  { %v1134_v53 = vpop.f32.mrf.mxu1 }
 0xbed   :  { %v2597_v54 = vpop.f32.mrf.mxu2 }
 0xbee   :  { %v1162_v13 = vsel %vm1044_vm7, %v2597_v54, -inf }
 0xbf5   :  { %v1157_v55 = vpop.f32.mrf.mxu2 }
 0xbf6   :  { %v1972_v55 = vld [vmem:[%s2783_s4 + $0x14] sm:$0xf] }
 0xbfa   :  { %1183 = vrot.lane.b32.xlu1 %v2561_v27, %s2266_s15 }
 0xc02   :  { %1280 = vrot.lane.b32.xlu1 %v2568_v33, %s2265_s14 }
 0xc0f   :  { %1049 = vmax.xlane.f32.xlu0 %v1048_v56 }
 0xc23   :  { %1090 = vrot.lane.b32.xlu0 %v2572_v34, %s2257_s19 }
 0xc2b   :  { %1305 = vrot.lane.b32.xlu0 %v2572_v34, %s2267_s16 }
 0xc44   :  { %v1047_v57 = vpop.xlane.xlu0 %1046 }
 0xc45   :  { %v1051_v58 = vsub.f32 %v1012_v47, %v1047_v57 }
 0xc47   :  { %v1053_v59 = vmul.f32 1.442695, %v1051_v58 }
 0xc49   :  { %2139 = vpow2.f32 %v1053_v59 }
 0xc4f   :  { %v2140_v60 = vpop.eup %2139 }
 0xc50   :  { %v1057_v61 = vsel %vm1044_vm7, %v2140_v60, 0.0 }
 0xc51   :  { %1058 = vadd.xlane.f32.xlu2 %v1057_v61 }
 0xc54   :  { %v1161_v62 = vpop.xlane.xlu1 %1160 }
 0xc55   :  { %v1165_v63 = vsub.f32 %v1132_v50, %v1161_v62  ;;  %v1971_v50 = vld [vmem:[%s2783_s4 + $0x10] sm:$0xf] }
 0xc56   :  { %v1265_v51 = vsel %vm248_vm5, %v1971_v50, 0 }
 0xc57   :  { %v1167_v0 = vmul.f32 1.442695, %v1165_v63  ;;  %v1070_v1 = vpop.permute.xlu0 %1069  ;;  %1274 = vmatpush.bf16.msra.mxu2 %v1265_v51 }
 0xc58   :  { %v1075_v2 = vsel %vm248_vm5, %v1070_v1, 0 }
 0xc59   :  { %2141 = vpow2.f32 %v1167_v0  ;;  %1084 = vmatpush.bf16.msra.mxu3 %v1075_v2 }
 0xc5f   :  { %v2142_v25 = vpop.eup %2141 }
 0xc60   :  { %v1171_v3 = vsel %vm1044_vm7, %v2142_v25, 0.0 }
 0xc61   :  { %1172 = vadd.xlane.f32.xlu2 %v1171_v3 }
 0xc6c   :  { %v1184_v4 = vpop.permute.xlu1 %1183 }
 0xc6d   :  { %v1189_v5 = vsel %vm248_vm5, %v1184_v4, 0 }
 0xc6e   :  { %1198 = vmatpush.bf16.msrb.mxu3 %v1189_v5 }
 0xc74   :  { %v1281_v31 = vpop.permute.xlu1 %1280 }
 0xc79   :  { %1282 = vrot.lane.b32.xlu2 %v2561_v27, %s2267_s16 }
 0xc82   :  { %v1050_v6 = vpop.xlane.xlu0 %1049 }
 0xc83   :  { %v1052_v7 = vsub.f32 %v1040_v49, %v1050_v6 }
 0xc85   :  { %v1055_v8 = vmul.f32 1.442695, %v1052_v7 }
 0xc87   :  { %2143 = vpow2.f32 %v1055_v8 }
 0xc8d   :  { %v2144_v9 = vpop.eup %2143 }
 0xc8e   :  { %v1060_v10 = vsel %vm1044_vm7, %v2144_v9, 0.0 }
 0xc8f   :  { %1061 = vadd.xlane.f32.xlu1 %v1060_v10 }
 0xc95   :  { %v1091_v11 = vpop.permute.xlu0 %1090 }
 0xc96   :  { %v1096_v12 = vsel %vm248_vm5, %v1091_v11, 0 }
 0xc97   :  { %1105 = vmatpush.bf16.msrb.mxu0 %v1096_v12 }
 0xc9d   :  { %v1306_v42 = vpop.permute.xlu0 %1305 }
 0xc9e   :  { %v1311_v44 = vsel %vm175_vm4, %v1306_v42, 0 }
 0xca2   :  { %1163 = vmax.xlane.f32.xlu2 %v1162_v13 }
 0xca8   :  { %1204 = vrot.lane.b32.xlu1 %v2572_v34, %s2266_s15 }
 0xcc4   :  { %v1059_v14 = vpop.xlane.xlu2 %1058 }
 0xcc5   :  { %2145 = vrcp.f32 %v1059_v14 }
 0xccb   :  { %v2146_v15 = vpop.eup %2145 }
 0xccc   :  { %v1065_v20 = vmul.f32 %v2146_v15, %v2140_v60 }
 0xcce   :  { %v1067_v21 = vpack.c.bf16 %v1065_v20, %v1065_v20 }
 0xcd0   :  { %1977 = vmatmul.msk.bf16.vlgmr.msra.gmra.mxu3 %vm175_vm4, %v1067_v21 }
 0xcd4   :  { %v1173_v22 = vpop.xlane.xlu2 %1172 }
 0xcd5   :  { %2147 = vrcp.f32 %v1173_v22 }
 0xcdb   :  { %v2148_v23 = vpop.eup %2147 }
 0xcdc   :  { %v1179_v24 = vmul.f32 %v2148_v23, %v2142_v25  ;;  %v1283_v26 = vpop.permute.xlu2 %1282 }
 0xcdd   :  { %v1288_v28 = vsel %vm175_vm4, %v1283_v26, 0 }
 0xcde   :  { %v1181_v29 = vpack.c.bf16 %v1179_v24, %v1179_v24  ;;  %1297 = vmatpush.bf16.xpose.msra.mxu3 %v1288_v28 }
 0xce0   :  { %1981 = vmatmul.msk.bf16.vlgmr.msrb.gmra.mxu3 %vm175_vm4, %v1181_v29 }
 0xcf0   :  { %1985 = vmatmul.msk.bf16.vlgmr.msra.gmra.mxu3 %vm175_vm4, %v1281_v31 }
 0xd02   :  { %v1062_v32 = vpop.xlane.xlu1 %1061 }
 0xd03   :  { %2149 = vrcp.f32 %v1062_v32 }
 0xd09   :  { %v2150_v17 = vpop.eup %2149 }
 0xd0a   :  { %v1066_v35 = vmul.f32 %v2150_v17, %v2144_v9 }
 0xd0c   :  { %v1068_v37 = vpack.c.bf16 %v1066_v35, %v1066_v35 }
 0xd0e   :  { %1978 = vmatmul.msk.bf16.vlgmr.msrb.gmra.mxu0 %vm175_vm4, %v1068_v37 }
 0xd15   :  { %v1164_v38 = vpop.xlane.xlu2 %1163 }
 0xd16   :  { %v1166_v39 = vsub.f32 %v2597_v54, %v1164_v38 }
 0xd18   :  { %v1169_v40 = vmul.f32 1.442695, %v1166_v39 }
 0xd1a   :  { %2151 = vpow2.f32 %v1169_v40  ;;  %v1205_v18 = vpop.permute.xlu1 %1204 }
 0xd1b   :  { %v1210_v43 = vsel %vm248_vm5, %v1205_v18, 0 }
 0xd1c   :  { %1219 = vmatpush.bf16.msra.mxu0 %v1210_v43 }
 0xd20   :  { %1320 = vmatpush.bf16.xpose.msrb.mxu0 %v1311_v44  ;;  %v2152_v45 = vpop.eup %2151 }
 0xd21   :  { %v1174_v46 = vsel %vm1044_vm7, %v2152_v45, 0.0 }
 0xd22   :  { %1175 = vadd.xlane.f32.xlu2 %v1174_v46 }
 0xd3a   :  { %1303 = vrot.lane.b32.xlu2 %v2579_v36, %s2265_s14 }
 0xd42   :  { %1350 = vrot.lane.b32.xlu2 %v2561_v27, %s2268_s17 }
 0xd4a   :  { %1446 = vrot.lane.b32.xlu2 %v2572_v34, %s2269_s18 }
 0xd52   :  { %1423 = vrot.lane.b32.xlu2 %v2561_v27, %s2269_s18 }
 0xd53   :  { %v1086_v47 = vpop.f32.mrf.mxu3 }
 0xd54   :  { %v1111_v57 = vpack.c.bf16 %v1086_v47, %v1086_v47 }
 0xd56   :  { %v1256_v60 = vunpack.c.l.b16 %v1111_v57 }
 0xd5a   :  { %1421 = vrot.lane.b32.xlu2 %v2568_v33, %s2270_s20  ;;  %v1239_v33 = vsel %vm248_vm5, %v1972_v55, 0 }
 0xd5b   :  { %v1088_v30 = vpop.f32.mrf.mxu3  ;;  %1248 = vmatpush.bf16.msra.mxu1 %v1239_v33 }
 0xd63   :  { %v1200_v48 = vpop.f32.mrf.mxu3 }
 0xd64   :  { %v1225_v24 = vpack.c.bf16 %v1200_v48, %v1200_v48 }
 0xd66   :  { %v1229_v31 = vunpack.c.l.b16 %v1225_v24 }
 0xd6b   :  { %v1202_v49 = vpop.f32.mrf.mxu3 }
 0xd73   :  { %v1299_v52 = vpop.f32.mrf.mxu3 }
 0xd74   :  { %v1326_v53 = vsel %vm1044_vm7, %v1299_v52, -inf }
 0xd75   :  { %1327 = vmax.xlane.f32.xlu0 %v1326_v53 }
 0xd7b   :  { %v1301_v54 = vpop.f32.mrf.mxu3 }
 0xd89   :  { %1444 = vrot.lane.b32.xlu0 %v2579_v36, %s2270_s20 }
 0xd8b   :  { %v1107_v56 = vpop.f32.mrf.mxu0 }
 0xd8c   :  { %v1112_v58 = vpack.c.bf16 %v1107_v56, %v1107_v56 }
 0xd8e   :  { %v1257_v59 = vunpack.c.l.b16 %v1112_v58 }
 0xd90   :  { %v1258_v61 = vrot.slane %v1257_v59, 7 }
 0xd91   :  { %1371 = vrot.lane.b32.xlu0 %v2572_v34, %s2268_s17 }
 0xd92   :  { %v1259_v62 = vsel %vm1232_vm8, %v1258_v61, %v1256_v60 }
 0xd93   :  { %v1260_v63 = vpack.c.b16 %v1259_v62, %v1259_v62  ;;  %v1109_v0 = vpop.f32.mrf.mxu0 }
 0xd95   :  { %v1176_v1 = vpop.xlane.xlu2 %1175  ;;  %1984 = vmatmul.msk.bf16.vlgmr.msra.gmra.mxu2 %vm175_vm4, %v1260_v63 }
 0xd96   :  { %2153 = vrcp.f32 %v1176_v1 }
 0xd9c   :  { %v2154_v2 = vpop.eup %2153 }
 0xd9d   :  { %v1180_v36 = vmul.f32 %v2154_v2, %v2152_v45  ;;  %v1304_v25 = vpop.permute.xlu2 %1303 }
 0xd9f   :  { %v1182_v3 = vpack.c.bf16 %v1180_v36, %v1180_v36 }
 0xda1   :  { %1982 = vmatmul.msk.bf16.vlgmr.msra.gmra.mxu0 %vm175_vm4, %v1182_v3 }
 0xda5   :  { %v1351_v4 = vpop.permute.xlu2 %1350 }
 0xda6   :  { %v1356_v5 = vsel %vm248_vm5, %v1351_v4, 0 }
 0xda7   :  { %1365 = vmatpush.bf16.msrb.mxu1 %v1356_v5 }
 0xdad   :  { %v1447_v6 = vpop.permute.xlu2 %1446 }
 0xdae   :  { %v1452_v38 = vsel %vm175_vm4, %v1447_v6, 0 }
 0xdb1   :  { %1986 = vmatmul.msk.bf16.vlgmr.msrb.gmra.mxu0 %vm175_vm4, %v1304_v25 }
 0xdb5   :  { %v1424_v7 = vpop.permute.xlu2 %1423 }
 0xdb6   :  { %v1429_v8 = vsel %vm175_vm4, %v1424_v7, 0 }
 0xdb7   :  { %1438 = vmatpush.bf16.xpose.msra.mxu0 %v1429_v8 }
 0xdbd   :  { %v1422_v9 = vpop.permute.xlu2 %1421 }
 0xdc1   :  { %1990 = vmatmul.msk.bf16.vlgmr.msra.gmra.mxu0 %vm175_vm4, %v1422_v9 }
 0xde8   :  { %v1328_v10 = vpop.xlane.xlu0 %1327 }
 0xde9   :  { %v1332_v11 = vsub.f32 %v1299_v52, %v1328_v10 }
 0xdeb   :  { %v1334_v12 = vmul.f32 1.442695, %v1332_v11 }
 0xded   :  { %2155 = vpow2.f32 %v1334_v12  ;;  %v1973_v12 = vld [vmem:[%s2783_s4 + $0x18] sm:$0xf] }
 0xdf3   :  { %v2156_v13 = vpop.eup %2155 }
 0xdf4   :  { %v1338_v14 = vsel %vm1044_vm7, %v2156_v13, 0.0 }
 0xdf5   :  { %1339 = vadd.xlane.f32.xlu1 %v1338_v14 }
 0xdfb   :  { %v1445_v15 = vpop.permute.xlu0 %1444 }
 0xe03   :  { %v1372_v20 = vpop.permute.xlu0 %1371 }
 0xe04   :  { %v1377_v21 = vsel %vm248_vm5, %v1372_v20, 0 }
 0xe05   :  { %1386 = vmatpush.bf16.msrb.mxu2 %v1377_v21 }
 0xe18   :  { %v2661_v22 = vpop.f32.mrf.mxu2 }
 0xe1e   :  { %v1221_v23 = vpop.f32.mrf.mxu0 }
 0xe1f   :  { %v1226_v26 = vpack.c.bf16 %v1221_v23, %v1221_v23 }
 0xe20   :  { %v1278_v28 = vpop.f32.mrf.mxu2 }
 0xe21   :  { %v1230_v29 = vunpack.c.l.b16 %v1226_v26 }
 0xe23   :  { %v1231_v32 = vrot.slane %v1230_v29, 7 }
 0xe25   :  { %v1233_v17 = vsel %vm1232_vm8, %v1231_v32, %v1229_v31 }
 0xe26   :  { %v1234_v35 = vpack.c.b16 %v1233_v17, %v1233_v17  ;;  %v1223_v37 = vpop.f32.mrf.mxu0 }
 0xe28   :  { %1983 = vmatmul.msk.bf16.vlgmr.msra.gmra.mxu1 %vm175_vm4, %v1234_v35 }
 0xe29   :  { %1461 = vmatpush.bf16.xpose.msra.mxu1 %v1452_v38 }
 0xe2e   :  { %v1322_v39 = vpop.f32.mrf.mxu0 }
 0xe2f   :  { %v1329_v40 = vsel %vm1044_vm7, %v1322_v39, -inf }
 0xe30   :  { %1330 = vmax.xlane.f32.xlu2 %v1329_v40 }
 0xe36   :  { %v1324_v42 = vpop.f32.mrf.mxu0 }
 0xe3e   :  { %v1440_v18 = vpop.f32.mrf.mxu0 }
 0xe3f   :  { %v1467_v43 = vsel %vm1044_vm7, %v1440_v18, -inf }
 0xe40   :  { %1468 = vmax.xlane.f32.xlu0 %v1467_v43 }
 0xe46   :  { %v1442_v44 = vpop.f32.mrf.mxu0 }
 0xe47   :  { %v1974_v44 = vld [vmem:[%s2783_s4 + $0x1c] sm:$0xf] }
 0xe48   :  { %1491 = vrot.lane.b32.xlu2 %v2561_v27, %s2271_s24 }
 0xe68   :  { %v1340_v45 = vpop.xlane.xlu1 %1339 }
 0xe69   :  { %2157 = vrcp.f32 %v1340_v45  ;;  %v1546_v45 = vsel %vm248_vm5, %v1974_v44, 0 }
 0xe6a   :  { %1555 = vmatpush.bf16.msrb.mxu0 %v1546_v45 }
 0xe6f   :  { %v2158_v46 = vpop.eup %2157 }
 0xe70   :  { %v1346_v47 = vmul.f32 %v2158_v46, %v2156_v13  ;;  %v1405_v13 = vsel %vm248_vm5, %v1973_v12, 0 }
 0xe71   :  { %1414 = vmatpush.bf16.msrb.mxu3 %v1405_v13 }
 0xe72   :  { %v1348_v30 = vpack.c.bf16 %v1346_v47, %v1346_v47 }
 0xe74   :  { %1987 = vmatmul.msk.bf16.vlgmr.msrb.gmra.mxu1 %vm175_vm4, %v1348_v30 }
 0xe84   :  { %1991 = vmatmul.msk.bf16.vlgmr.msra.gmra.mxu1 %vm175_vm4, %v1445_v15 }
 0xea3   :  { %v1331_v48 = vpop.xlane.xlu2 %1330 }
 0xea4   :  { %v1333_v49 = vsub.f32 %v1322_v39, %v1331_v48 }
 0xea5   :  { %v2672_v50 = vpop.f32.mrf.mxu1 }
 0xea6   :  { %v1336_v51 = vmul.f32 1.442695, %v1333_v49  ;;  %v1277_v40 = vadd.f32 %v2661_v22, %v2672_v50  ;;  %v2089_v50 = vld [vmem:[%s2787_s8 + $0x9] ss:$0 sm:$0xff] }
 0xea8   :  { %2159 = vpow2.f32 %v1336_v51 }
 0xeab   :  { %v1492_v52 = vpop.permute.xlu2 %1491 }
 0xeac   :  { %v1497_v53 = vsel %vm248_vm5, %v1492_v52, 0 }
 0xead   :  { %v1252_v54 = vpop.f32.mrf.mxu1  ;;  %1506 = vmatpush.bf16.msra.mxu2 %v1497_v53 }
 0xeae   :  { %v2160_v27 = vpop.eup %2159 }
 0xeaf   :  { %v1341_v55 = vsel %vm1044_vm7, %v2160_v27, 0.0 }
 0xeb0   :  { %1342 = vadd.xlane.f32.xlu1 %v1341_v55 }
 0xeb3   :  { %v1469_v56 = vpop.xlane.xlu0 %1468 }
 0xeb4   :  { %v1473_v57 = vsub.f32 %v1440_v18, %v1469_v56 }
 0xeb6   :  { %v1475_v59 = vmul.f32 1.442695, %v1473_v57 }
 0xeb8   :  { %2161 = vpow2.f32 %v1475_v59 }
 0xebe   :  { %v2162_v62 = vpop.eup %2161 }
 0xebf   :  { %v1479_v0 = vsel %vm1044_vm7, %v2162_v62, 0.0 }
 0xef1   :  { %v1367_v33 = vpop.f32.mrf.mxu1 }
 0xef2   :  { %v1392_v15 = vpack.c.bf16 %v1367_v33, %v1367_v33 }
 0xef4   :  { %v1396_v23 = vunpack.c.l.b16 %v1392_v15 }
 0xef9   :  { %v1369_v58 = vpop.f32.mrf.mxu1 }
 0xf01   :  { %v1463_v60 = vpop.f32.mrf.mxu1 }
 0xf02   :  { %v1470_v61 = vsel %vm1044_vm7, %v1463_v60, -inf }
 0xf03   :  { %1471 = vmax.xlane.f32.xlu1 %v1470_v61 }
 0xf09   :  { %v1465_v63 = vpop.f32.mrf.mxu1 }
 0xf0b   :  { %1480 = vadd.xlane.f32.xlu1 %v1479_v0 }
 0xf23   :  { %v1343_v1 = vpop.xlane.xlu1 %1342 }
 0xf24   :  { %2163 = vrcp.f32 %v1343_v1 }
 0xf2a   :  { %v2164_v2 = vpop.eup %2163 }
 0xf2b   :  { %v1347_v36 = vmul.f32 %v2164_v2, %v2160_v27 }
 0xf2d   :  { %v1349_v25 = vpack.c.bf16 %v1347_v36, %v1347_v36 }
 0xf2f   :  { %1988 = vmatmul.msk.bf16.vlgmr.msrb.gmra.mxu2 %vm175_vm4, %v1349_v25 }
 0xf76   :  { %v1472_v3 = vpop.xlane.xlu1 %1471 }
 0xf77   :  { %v1474_v4 = vsub.f32 %v1463_v60, %v1472_v3 }
 0xf79   :  { %v1477_v5 = vmul.f32 1.442695, %v1474_v4 }
 0xf7b   :  { %2165 = vpow2.f32 %v1477_v5 }
 0xf7e   :  { %v1481_v6 = vpop.xlane.xlu1 %1480 }
 0xf7f   :  { %2167 = vrcp.f32 %v1481_v6 }
 0xf81   :  { %v2166_v7 = vpop.eup %2165 }
 0xf82   :  { %v1482_v8 = vsel %vm1044_vm7, %v2166_v7, 0.0 }
 0xf83   :  { %1483 = vadd.xlane.f32.xlu1 %v1482_v8  ;;  %v2054_v8 = vld [vmem:[%s2784_s5 + $0x18] sm:$0xff] }
 0xf84   :  { %1696 = vmatpush.bf16.msrb.mxu1 %v2054_v8 }
 0xf85   :  { %v2168_v9 = vpop.eup %2167 }
 0xf86   :  { %v1487_v10 = vmul.f32 %v2168_v9, %v2162_v62 }
 0xf88   :  { %v1489_v11 = vpack.c.bf16 %v1487_v10, %v1487_v10  ;;  %v2053_v10 = vld [vmem:[%s2784_s5 + $0x10] sm:$0xff] }
 0xf89   :  { %1697 = vmatpush.bf16.msrb.mxu1 %v2053_v10 }
 0xf8a   :  { %1992 = vmatmul.msk.bf16.vlgmr.msra.gmra.mxu2 %vm175_vm4, %v1489_v11 }
 0xf9c   :  { %1512 = vrot.lane.b32.xlu1 %v2572_v34, %s2271_s24 }
 0xfb2   :  { %v1388_v14 = vpop.f32.mrf.mxu2 }
 0xfb3   :  { %v1393_v20 = vpack.c.bf16 %v1388_v14, %v1388_v14 }
 0xfb5   :  { %v1397_v21 = vunpack.c.l.b16 %v1393_v20 }
 0xfb7   :  { %v1398_v24 = vrot.slane %v1397_v21, 7 }
 0xfb9   :  { %v1399_v26 = vsel %vm1232_vm8, %v1398_v24, %v1396_v23  ;;  %v2058_v23 = vld [vmem:[%s2785_s6 + $0x38] sm:$0xff] }
 0xfba   :  { %v1400_v28 = vpack.c.b16 %v1399_v26, %v1399_v26  ;;  %v1390_v29 = vpop.f32.mrf.mxu2  ;;  %1748 = vmatpush.bf16.msrb.mxu2 %v2058_v23  ;;  %v2057_v26 = vld [vmem:[%s2785_s6 + $0x30] sm:$0xff] }
 0xfbc   :  { %1989 = vmatmul.msk.bf16.vlgmr.msrb.gmra.mxu3 %vm175_vm4, %v1400_v28 }
 0xfbe   :  { %1749 = vmatpush.bf16.msrb.mxu2 %v2057_v26 }
 0xff6   :  { %v1484_v31 = vpop.xlane.xlu1 %1483 }
 0xff7   :  { %2169 = vrcp.f32 %v1484_v31 }
 0xffd   :  { %v2170_v32 = vpop.eup %2169 }
 0xffe   :  { %v1488_v17 = vmul.f32 %v2170_v32, %v2166_v7 }
0x1000   :  { %v1490_v38 = vpack.c.bf16 %v1488_v17, %v1488_v17 }
0x100d   :  { %v1508_v35 = vpop.f32.mrf.mxu2 }
0x100e   :  { %v1513_v37 = vpop.permute.xlu1 %1512  ;;  %v1533_v47 = vpack.c.bf16 %v1508_v35, %v1508_v35 }
0x100f   :  { %v1518_v34 = vsel %vm248_vm5, %v1513_v37, 0  ;;  %vm1580_vm5 = vcmask 261127  }
0x1010   :  { %1527 = vmatpush.bf16.msra.mxu3 %v1518_v34  ;;  %v1537_v49 = vunpack.c.l.b16 %v1533_v47 }
0x1013   :  { %1993 = vmatmul.msk.bf16.vlgmr.msra.gmra.mxu3 %vm175_vm4, %v1490_v38 }
0x1015   :  { %v1510_v39 = vpop.f32.mrf.mxu2 }
0x103f   :  { %v1416_v42 = vpop.f32.mrf.mxu3 }
0x1040   :  { %v1420_v18 = vadd.f32 %v1416_v42, %v1277_v40  ;;  %v2090_v40 = vld [vmem:[%s2787_s8 + $0xa] ss:$0 sm:$0xff] }
0x1047   :  { %v1418_v43 = vpop.f32.mrf.mxu3 }
0x1048   :  { %v2091_v43 = vld [vmem:[%s2787_s8 + $0xb] ss:$0 sm:$0xff] }
0x1096   :  { %v1529_v46 = vpop.f32.mrf.mxu3 }
0x1097   :  { %v1534_v30 = vpack.c.bf16 %v1529_v46, %v1529_v46 }
0x1099   :  { %v1538_v48 = vunpack.c.l.b16 %v1534_v30 }
0x109b   :  { %v1539_v51 = vrot.slane %v1538_v48, 7 }
0x109d   :  { %v1540_v52 = vsel %vm1232_vm8, %v1539_v51, %v1537_v49 }
0x109e   :  { %v1541_v53 = vpack.c.b16 %v1540_v52, %v1540_v52  ;;  %v1531_v22 = vpop.f32.mrf.mxu3 }
0x10a0   :  { %1994 = vmatmul.msk.bf16.vlgmr.msrb.gmra.mxu0 %vm175_vm4, %v1541_v53 }
0x111d   :  { %v1557_v54 = vpop.f32.mrf.mxu0 }
0x111e   :  { %v1561_v27 = vadd.f32 %v1557_v54, %v1420_v18 }
0x1120   :  { %v1565_v55 = vadd.f32 %v2089_v50, %v1561_v27 }
0x1122   :  { %v1567_v33 = vrot.slane %v1565_v55, 1  ;;  %v1568_v56 = vrot.slane %v1565_v55, 2 }
0x1124   :  { %v1572_v57 = vadd.f32 %v1568_v56, %v2553_v19  ;;  %v2704_v58 = vadd.f32 %v1567_v33, %v2551_v16 }
0x1125   :  { %v1559_v59 = vpop.f32.mrf.mxu0 }
0x1126   :  { %v1581_v60 = vsel %vm1580_vm5, %v2704_v58, 0.0  ;;  %v1577_v61 = vrot.slane %v1572_v57, 7  ;;  %v1591_v62 = vmul.f32 %v1572_v57, %v1572_v57  ;;  %v1590_v19 = vmul.f32 %v2704_v58, %v2704_v58  ;;  %v2092_v59 = vld [vmem:[%s2787_s8 + $0xc] ss:$0 sm:$0xff] }
0x1127   :  { %1582 = vadd.xlane.f32.xlu1 %v1581_v60 }
0x1128   :  { %v1585_v63 = vsel %vm1584_vm9, %v1577_v61, 0.0  ;;  %v1594_v0 = vrot.slane %v1591_v62, 7  ;;  %v1597_v16 = vsel %vm1580_vm5, %v1590_v19, 0.0 }
0x1129   :  { %1586 = vadd.xlane.f32.xlu0 %v1585_v63 }
0x112a   :  { %v1600_v1 = vsel %vm1584_vm9, %v1594_v0, 0.0 }
0x112b   :  { %1601 = vadd.xlane.f32.xlu2 %v1600_v1  ;;  %v2093_v1 = vld [vmem:[%s2787_s8 + $0xd] ss:$0 sm:$0xff] }
0x1131   :  { %1598 = vadd.xlane.f32.xlu0 %v1597_v16 }
0x119a   :  { %v1583_v25 = vpop.xlane.xlu1 %1582 }
0x119b   :  { %v1588_v6 = vmul.f32 %v1583_v25, %v2492_v41 }
0x119c   :  { %v1587_v2 = vpop.xlane.xlu0 %1586 }
0x119d   :  { %v1589_v36 = vmul.f32 %v1587_v2, %v2492_v41  ;;  %v1605_v12 = vmul.f32 %v1588_v6, %v1588_v6  ;;  %v1614_v46 = vsub.f32 %v2704_v58, %v1588_v6  ;;  %v2055_v58 = vld [vmem:[%s2785_s6 + $0x20] sm:$0xff] }
0x119e   :  { %v1602_v3 = vpop.xlane.xlu2 %1601 }
0x119f   :  { %v1606_v4 = vmul.f32 %v1589_v36, %v1589_v36  ;;  %v1604_v5 = vmul.f32 %v1602_v3, %v2492_v41  ;;  %v1611_v17 = vrot.slane %v1589_v36, 1 }
0x11a1   :  { %v1608_v7 = vsub.f32 %v1604_v5, %v1606_v4  ;;  %v1615_v39 = vsub.f32 %v1572_v57, %v1611_v17  ;;  %v2056_v57 = vld [vmem:[%s2785_s6 + $0x28] sm:$0xff] }
0x11a2   :  { %1750 = vmatpush.bf16.msrb.mxu2 %v2056_v57 }
0x11a3   :  { %v1617_v9 = vadd.f32 1e-05, %v1608_v7 }
0x11a4   :  { %v1599_v11 = vpop.xlane.xlu0 %1598 }
0x11a5   :  { %2171 = vrsqrt.f32 %v1617_v9  ;;  %v1603_v13 = vmul.f32 %v1599_v11, %v2492_v41  ;;  %vm1634_vm10 = vweird.f32 %v1617_v9 }
0x11a6   :  { %1751 = vmatpush.bf16.msrb.mxu2 %v2055_v58 }
0x11a7   :  { %v1607_v14 = vsub.f32 %v1603_v13, %v1605_v12 }
0x11a9   :  { %v1616_v15 = vadd.f32 1e-05, %v1607_v14 }
0x11ab   :  { %v2172_v20 = vpop.eup %2171  ;;  %2173 = vrsqrt.f32 %v1616_v15  ;;  %vm1624_vm14 = vweird.f32 %v1616_v15 }
0x11ac   :  { %v1629_v21 = vmul.f32 %v2172_v20, %v1617_v9  ;;  %vm1635_vm4 = vweird.f32 %v2172_v20 }
0x11ad   :  { %vm1636_vm11 = vmor %vm1634_vm10, %vm1635_vm4 }
0x11ae   :  { %v1630_v24 = vmul.f32 %v2172_v20, %v1629_v21 }
0x11b0   :  { %v1631_v28 = vmul.f32 0.5, %v1630_v24 }
0x11b1   :  { %v2174_v29 = vpop.eup %2173 }
0x11b2   :  { %v1632_v31 = vsub.f32 1.5, %v1631_v28  ;;  %v1619_v32 = vmul.f32 %v2174_v29, %v1616_v15  ;;  %vm1625_vm12 = vweird.f32 %v2174_v29 }
0x11b3   :  { %vm1626_vm15 = vmor %vm1624_vm14, %vm1625_vm12 }
0x11b4   :  { %v1633_v35 = vmul.f32 %v2172_v20, %v1632_v31  ;;  %v1620_v37 = vmul.f32 %v2174_v29, %v1619_v32  ;;  %v2059_v31 = vld [vmem:[#allocation6] sm:$0xff] }
0x11b6   :  { %v1637_v34 = vsel %vm1636_vm11, %v2172_v20, %v1633_v35  ;;  %v1621_v38 = vmul.f32 0.5, %v1620_v37 }
0x11b7   :  { %v1640_v42 = vrot.slane %v1637_v34, 1 }
0x11b8   :  { %v1622_v18 = vsub.f32 1.5, %v1621_v38 }
0x11b9   :  { %v1644_v44 = vmul.f32 %v1640_v42, %v1615_v39 }
0x11ba   :  { %v1623_v45 = vmul.f32 %v2174_v29, %v1622_v18 }
0x11bb   :  { %v1649_v47 = vmul.f32 %v2090_v40, %v1644_v44 }
0x11bc   :  { %v1627_v30 = vsel %vm1626_vm15, %v2174_v29, %v1623_v45  ;;  %v2060_v29 = vld [vmem:[#allocation6 + $0x8] sm:$0xff] }
0x11bd   :  { %v1654_v48 = vadd.f32 %v2091_v43, %v1649_v47  ;;  %v1643_v49 = vmul.f32 %v1627_v30, %v1614_v46  ;;  %1882 = vmatpush.bf16.msrb.mxu3 %v2060_v29 }
0x11bf   :  { %v1648_v51 = vmul.f32 %v2090_v40, %v1643_v49  ;;  %v1658_v52 = vpack.c.bf16 %v1654_v48, %v1654_v48 }
0x11c1   :  { %v1653_v53 = vadd.f32 %v2091_v43, %v1648_v51  ;;  %v1670_v50 = vunpack.c.l.b16 %v1658_v52  ;;  %1883 = vmatpush.bf16.msrb.mxu3 %v2059_v31  ;;  %v2094_v51 = vld [vmem:[%s2787_s8 + $0xe] ss:$0 sm:$0xff] }
0x11c3   :  { %v1657_v22 = vpack.c.bf16 %v1653_v53, %v1653_v53  ;;  %v1672_v55 = vrot.slane %v1670_v50, 6 }
0x11c5   :  { %v1669_v54 = vunpack.c.l.b16 %v1657_v22 }
0x11c7   :  { %v1671_v27 = vrot.slane %v1669_v54, 7  ;;  %v2095_v54 = vld [vmem:[%s2787_s8 + $0xf] ss:$0 sm:$0xff] }
0x11c9   :  { %v1673_v33 = vsel %vm1232_vm8, %v1672_v55, %v1671_v27 }
0x11ca   :  { %v1674_v56 = vpack.c.b16 %v1673_v33, %v1673_v33 }
0x11cc   :  { %2007 = vmatmul.msk.bf16.vlgmr.msrb.gmra.mxu1 %vm146_vm3, %v1674_v56 }
0x1249   :  { %v1699_v60 = vpop.f32.mrf.mxu1 }
0x124a   :  { %v1700_v61 = vadd.f32 %v2092_v59, %v1699_v60 }
0x124c   :  { %v1703_v62 = vmax.f32 %v1700_v61, 0.0 }
0x124e   :  { %v1704_v63 = vpack.c.bf16 %v1703_v62, %v1703_v62 }
0x1250   :  { %2032 = vmatmul.msk.bf16.vlgmr.msrb.gmra.mxu2 %vm861_vm13, %v1704_v63 }
0x1251   :  { %v1701_v0 = vpop.f32.mrf.mxu1 }
0x1252   :  { %v2096_v0 = vld [vmem:[%s2787_s8 + $0x10] ss:$0 sm:$0xff] }
0x12d3   :  { %v1753_v19 = vpop.f32.mrf.mxu2 }
0x12d4   :  { %v1754_v16 = vadd.f32 %v2093_v1, %v1753_v19 }
0x12d6   :  { %v1758_v2 = vrot.slane %v1754_v16, 1  ;;  %v1759_v36 = vrot.slane %v1754_v16, 2 }
0x12d8   :  { %v2751_v25 = vadd.f32 %v1758_v2, %v1653_v53  ;;  %v1763_v3 = vadd.f32 %v1759_v36, %v1654_v48 }
0x12da   :  { %v1771_v4 = vsel %vm1580_vm5, %v2751_v25, 0.0  ;;  %v1768_v6 = vrot.slane %v1763_v3, 7  ;;  %v1780_v8 = vmul.f32 %v1763_v3, %v1763_v3  ;;  %v1779_v11 = vmul.f32 %v2751_v25, %v2751_v25 }
0x12db   :  { %v1755_v5 = vpop.f32.mrf.mxu2  ;;  %1772 = vadd.xlane.f32.xlu0 %v1771_v4 }
0x12dc   :  { %v1774_v7 = vsel %vm1584_vm9, %v1768_v6, 0.0  ;;  %v1783_v9 = vrot.slane %v1780_v8, 7  ;;  %v1786_v12 = vsel %vm1580_vm5, %v1779_v11, 0.0  ;;  %vm1850_vm5 = vcmask 1041408  }
0x12de   :  { %v1789_v10 = vsel %vm1584_vm9, %v1783_v9, 0.0 }
0x12e3   :  { %1775 = vadd.xlane.f32.xlu0 %v1774_v7 }
0x12eb   :  { %1790 = vadd.xlane.f32.xlu0 %v1789_v10 }
0x12f3   :  { %1787 = vadd.xlane.f32.xlu0 %v1786_v12 }
0x134e   :  { %v1773_v13 = vpop.xlane.xlu0 %1772 }
0x134f   :  { %v1777_v26 = vmul.f32 %v1773_v13, %v2492_v41 }
0x1351   :  { %v1794_v17 = vmul.f32 %v1777_v26, %v1777_v26  ;;  %v1803_v50 = vsub.f32 %v2751_v25, %v1777_v26 }
0x1356   :  { %v1776_v14 = vpop.xlane.xlu0 %1775 }
0x1357   :  { %v1778_v15 = vmul.f32 %v1776_v14, %v2492_v41 }
0x1359   :  { %v1795_v21 = vmul.f32 %v1778_v15, %v1778_v15  ;;  %v1800_v44 = vrot.slane %v1778_v15, 1 }
0x135b   :  { %v1804_v48 = vsub.f32 %v1763_v3, %v1800_v44 }
0x135e   :  { %v1791_v20 = vpop.xlane.xlu0 %1790 }
0x135f   :  { %v1793_v23 = vmul.f32 %v1791_v20, %v2492_v41 }
0x1361   :  { %v1797_v24 = vsub.f32 %v1793_v23, %v1795_v21 }
0x1363   :  { %v1806_v28 = vadd.f32 1e-05, %v1797_v24 }
0x1365   :  { %2175 = vrsqrt.f32 %v1806_v28  ;;  %vm1823_vm0 = vweird.f32 %v1806_v28 }
0x1366   :  { %v1788_v32 = vpop.xlane.xlu0 %1787 }
0x1367   :  { %v1792_v35 = vmul.f32 %v1788_v32, %v2492_v41 }
0x1369   :  { %v1796_v37 = vsub.f32 %v1792_v35, %v1794_v17 }
0x136b   :  { %v2176_v34 = vpop.eup %2175  ;;  %v1805_v38 = vadd.f32 1e-05, %v1796_v37 }
0x136c   :  { %v1818_v39 = vmul.f32 %v2176_v34, %v1806_v28  ;;  %vm1824_vm13 = vweird.f32 %v2176_v34 }
0x136d   :  { %2177 = vrsqrt.f32 %v1805_v38  ;;  %vm1825_vm1 = vmor %vm1823_vm0, %vm1824_vm13  ;;  %vm1813_vm6 = vweird.f32 %v1805_v38 }
0x136e   :  { %v1819_v40 = vmul.f32 %v2176_v34, %v1818_v39 }
0x1370   :  { %v1820_v42 = vmul.f32 0.5, %v1819_v40 }
0x1372   :  { %v1821_v18 = vsub.f32 1.5, %v1820_v42 }
0x1373   :  { %v2178_v43 = vpop.eup %2177 }
0x1374   :  { %v1822_v45 = vmul.f32 %v2176_v34, %v1821_v18  ;;  %v1808_v46 = vmul.f32 %v2178_v43, %v1805_v38  ;;  %vm1814_vm2 = vweird.f32 %v2178_v43 }
0x1375   :  { %vm1815_vm7 = vmor %vm1813_vm6, %vm1814_vm2 }
0x1376   :  { %v1826_v47 = vsel %vm1825_vm1, %v2176_v34, %v1822_v45  ;;  %v1809_v30 = vmul.f32 %v2178_v43, %v1808_v46 }
0x1377   :  { %v1829_v41 = vrot.slane %v1826_v47, 1 }
0x1378   :  { %v1810_v49 = vmul.f32 0.5, %v1809_v30 }
0x1379   :  { %v1833_v52 = vmul.f32 %v1829_v41, %v1804_v48 }
0x137a   :  { %v1811_v53 = vsub.f32 1.5, %v1810_v49 }
0x137b   :  { %v1838_v27 = vmul.f32 %v2094_v51, %v1833_v52 }
0x137c   :  { %v1812_v22 = vmul.f32 %v2178_v43, %v1811_v53 }
0x137d   :  { %v1843_v56 = vadd.f32 %v2095_v54, %v1838_v27 }
0x137e   :  { %v1816_v55 = vsel %vm1815_vm7, %v2178_v43, %v1812_v22 }
0x137f   :  { %v1832_v33 = vmul.f32 %v1816_v55, %v1803_v50  ;;  %v1847_v59 = vrot.slane %v1843_v56, 6 }
0x1381   :  { %v1837_v57 = vmul.f32 %v2094_v51, %v1832_v33 }
0x1383   :  { %v1842_v58 = vadd.f32 %v2095_v54, %v1837_v57 }
0x1385   :  { %v1846_v60 = vrot.slane %v1842_v58, 7 }
0x1387   :  { %v1848_v61 = vsel %vm1232_vm8, %v1847_v59, %v1846_v60 }
0x1388   :  { %v1851_v62 = vsel %vm1850_vm5, %v1848_v61, 0.0 }
0x1389   :  { %v1853_v63 = vpack.c.bf16 %v1851_v62, %v1851_v62 }
0x138b   :  { %2041 = vmatmul.msk.bf16.vlgmr.msrb.gmra.mxu3 %vm146_vm3, %v1853_v63 }
0x140e   :  { %v1885_v1 = vpop.f32.mrf.mxu3 }
0x140f   :  { %v1886_v19 = vadd.f32 %v2096_v0, %v1885_v1 }
0x1411   :  { %1889 = vst [vmem:[%s2788_s9] sm:$0xff] %v1886_v19 }
0x1416   :  { %v1887_v16 = vpop.f32.mrf.mxu3 }
0x1417   :  { %1894 = vsyncpa [#allocation3], 1 }
0x1418   :  { %1895 = vsyncpa [#allocation5], 1 }

</bundles_post_ra>
